<compile_context>
chip_gen: v6e
topology: v6e:2x2x1
jax: 0.10.0
libtpu: 0.0.40
codegen_flags: <defaults>
</compile_context>

<pallas_src>
import jax
import jax.numpy as jnp
from jax.experimental import pallas as pl
from jax.experimental.pallas import tpu as pltpu


# ----------------------------------------------------------------------------
# One LSTM cell elementwise update from pre-activation gates (PyTorch order
# i, f, g, o).  Gate math stays in f32.
# ----------------------------------------------------------------------------
def _cell(gates, c, H):
    sg = jax.nn.sigmoid(gates)          # whole-vreg EUP op
    tg = jnp.tanh(gates)                # whole-vreg EUP op
    i = sg[:, 0 * H:1 * H]
    f = sg[:, 1 * H:2 * H]
    g = tg[:, 2 * H:3 * H]
    o = sg[:, 3 * H:4 * H]
    c_new = f * c + i * g
    h_new = o * jnp.tanh(c_new)
    return h_new, c_new


# ----------------------------------------------------------------------------
# Fused CharRNN kernel: L wavefront-interleaved LSTM layers + final Linear.
#
# Inputs : x(B,T,V) bf16,
#          layer0: w_ih0_t(V,4H) bf16, w_hh0_t(H,4H) bf16, b0(1,4H) f32,
#          layers 1..L-1: w_cat_l(2H,4H) bf16, b_l(1,4H) f32,
#          w_fc_t(H,Vp) bf16, b_fc(1,Vp) f32, h0(L,B,H) f32, c0(L,B,H) f32
# Outputs: out(B*T,Vp) f32, h_n(L,B,H) f32, c_n(L,B,H) f32
# Scratch: seq(B,T,H) f32  (top-layer hidden sequence, feeds the FC)
# ----------------------------------------------------------------------------
def _make_char_rnn_kernel(n_layers):
    L = n_layers

    def kernel(*refs):
        n_in = 2 * L + 6
        in_refs = refs[:n_in]
        out_ref, hn_ref, cn_ref = refs[n_in:n_in + 3]
        seq_scr = refs[n_in + 3]

        idx = 0
        x_ref = in_refs[idx]; idx += 1
        wih0_ref = in_refs[idx]; idx += 1
        whh0_ref = in_refs[idx]; idx += 1
        b0_ref = in_refs[idx]; idx += 1
        wcat_refs, b_refs = [], []
        for _ in range(1, L):
            wcat_refs.append(in_refs[idx]); idx += 1
            b_refs.append(in_refs[idx]); idx += 1
        wfc_ref = in_refs[idx]; idx += 1
        bfc_ref = in_refs[idx]; idx += 1
        h0_ref = in_refs[idx]; idx += 1
        c0_ref = in_refs[idx]; idx += 1

        x = x_ref[...]                                     # (B, T, V) bf16
        B, T, _ = x.shape
        H = h0_ref.shape[-1]

        # Hoisted layer-0 input projection: one matmul for all timesteps.
        gx0 = jnp.dot(x.reshape(B * T, x.shape[-1]), wih0_ref[...],
                      preferred_element_type=jnp.float32) + b0_ref[...]
        gx0 = gx0.reshape(B, T, 4 * H)                     # (B, T, 4H) f32

        w_hh0 = whh0_ref[...]                              # (H, 4H) bf16
        wcats = [w[...] for w in wcat_refs]                # (2H, 4H) bf16
        bs = [b[...] for b in b_refs]                      # (1, 4H)  f32

        h = [h0_ref[l] for l in range(L)]                  # f32 states
        c = [c0_ref[l] for l in range(L)]

        # Wavefront-interleaved time loop, fully unrolled (T, L static/small).
        # At step s, layer l computes timestep t = s - l; all matmuls inside
        # one step depend only on pre-step state -> they overlap on the MXU.
        for s in range(T + L - 1):
            pending = []
            for l in range(L):
                t = s - l
                if 0 <= t < T:
                    if l == 0:
                        g = gx0[:, t, :] + jnp.dot(
                            h[0].astype(jnp.bfloat16), w_hh0,
                            preferred_element_type=jnp.float32)
                    else:
                        # input-proj + recurrent matmul fused: [h_{l-1}, h_l]
                        lhs = jnp.concatenate([h[l - 1], h[l]],
                                              axis=-1).astype(jnp.bfloat16)
                        g = jnp.dot(lhs, wcats[l - 1],
                                    preferred_element_type=jnp.float32) \
                            + bs[l - 1]
                    pending.append((l, t, g))
            # Elementwise cell updates (states only advance after all matmuls
            # of this wavefront step were issued with the old states).
            for l, t, g in pending:
                h[l], c[l] = _cell(g, c[l], H)
                if l == L - 1:
                    seq_scr[:, t, :] = h[l]                # static row offset

        # Final states, written exactly once per layer.
        for l in range(L):
            hn_ref[l] = h[l]
            cn_ref[l] = c[l]

        # Inter-layer LSTM dropout / self.dropout: identity in eval mode.

        # FC over the flattened top-layer sequence; rows are in (b*T + t)
        # order, output columns are lane-dense (padded to 128 in the wrapper).
        flat = seq_scr[...].reshape(B * T, H).astype(jnp.bfloat16)
        out_ref[...] = jnp.dot(flat, wfc_ref[...],
                               preferred_element_type=jnp.float32) + bfc_ref[...]

    return kernel


# ----------------------------------------------------------------------------
# CharRNN forward: x (B, T, vocab) one-hot, hidden = (h0, c0) each (L, B, H)
# ----------------------------------------------------------------------------
@jax.jit
def char_rnn_forward(x, hidden, params):
    h0, c0 = hidden
    B, T, V = x.shape
    L, _, H = h0.shape
    Vp = ((V + 127) // 128) * 128          # lane-dense FC output width

    # bf16 matmul operands (f32 accumulation inside the kernel).
    args = [x.astype(jnp.bfloat16)]
    p0 = params["lstm"][0]
    args += [p0["w_ih_t"].astype(jnp.bfloat16),
             p0["w_hh_t"].astype(jnp.bfloat16),
             p0["b"]]
    for l in range(1, L):
        p = params["lstm"][l]
        w_cat = jnp.concatenate([p["w_ih_t"], p["w_hh_t"]],
                                axis=0).astype(jnp.bfloat16)   # (2H, 4H)
        args += [w_cat, p["b"]]
    w_fc = jnp.pad(params["fc"]["w_t"],
                   ((0, 0), (0, Vp - V))).astype(jnp.bfloat16)  # (H, Vp)
    b_fc = jnp.pad(params["fc"]["b"], ((0, 0), (0, Vp - V)))    # (1, Vp)
    args += [w_fc, b_fc, h0, c0]

    in_specs = [pl.BlockSpec(memory_space=pltpu.MemorySpace.VMEM)
                for _ in args]
    out_specs = tuple(pl.BlockSpec(memory_space=pltpu.MemorySpace.VMEM)
                      for _ in range(3))

    flops = (2 * B * T * V * 4 * H                 # hoisted layer-0 input proj
             + T * 2 * B * H * 4 * H               # layer-0 recurrent matmuls
             + (L - 1) * T * 2 * B * 2 * H * 4 * H  # fused layer>=1 matmuls
             + 2 * B * T * H * Vp)                 # FC
    transcendentals = L * T * B * (4 * H + 4 * H + H)
    bytes_accessed = (sum(a.size * a.dtype.itemsize for a in args)
                      + (B * T * Vp + 2 * L * B * H) * 4)

    out_p, h_n, c_n = pl.pallas_call(
        _make_char_rnn_kernel(L),
        out_shape=(jax.ShapeDtypeStruct((B * T, Vp), jnp.float32),
                   jax.ShapeDtypeStruct((L, B, H), jnp.float32),
                   jax.ShapeDtypeStruct((L, B, H), jnp.float32)),
        in_specs=in_specs,
        out_specs=out_specs,
        scratch_shapes=[pltpu.VMEM((B, T, H), jnp.float32)],
        cost_estimate=pl.CostEstimate(flops=flops,
                                      transcendentals=transcendentals,
                                      bytes_accessed=bytes_accessed),
    )(*args)
    return out_p[:, :V], (h_n, c_n)


# ----------------------------------------------------------------------------
# Pure-JAX reference with the SAME bf16 dot-boundary casts (sanity check).
# ----------------------------------------------------------------------------
def char_rnn_reference(x, hidden, params):
    h_all, c_all = hidden
    B, T, V = x.shape
    L, _, H = h_all.shape
    seq = x
    h_out, c_out = [], []
    for l in range(L):
        p = params["lstm"][l]
        w_ih = p["w_ih_t"].astype(jnp.bfloat16)
        w_hh = p["w_hh_t"].astype(jnp.bfloat16)
        b = p["b"]
        h, c = h_all[l], c_all[l]
        outs = []
        for t in range(T):
            gates = (jnp.dot(seq[:, t, :].astype(jnp.bfloat16), w_ih,
                             preferred_element_type=jnp.float32)
                     + jnp.dot(h.astype(jnp.bfloat16), w_hh,
                               preferred_element_type=jnp.float32) + b)
            i = jax.nn.sigmoid(gates[:, 0 * H:1 * H])
            f = jax.nn.sigmoid(gates[:, 1 * H:2 * H])
            g = jnp.tanh(gates[:, 2 * H:3 * H])
            o = jax.nn.sigmoid(gates[:, 3 * H:4 * H])
            c = f * c + i * g
            h = o * jnp.tanh(c)
            outs.append(h)
        seq = jnp.stack(outs, axis=1)                  # (B, T, H) f32
        h_out.append(h)
        c_out.append(c)
    flat = seq.reshape(B * T, H).astype(jnp.bfloat16)
    out = (jnp.dot(flat, params["fc"]["w_t"].astype(jnp.bfloat16),
                   preferred_element_type=jnp.float32) + params["fc"]["b"])
    return out, (jnp.stack(h_out), jnp.stack(c_out))


# ----------------------------------------------------------------------------
# Deterministic parameter init (PyTorch-style uniform(-1/sqrt(H), 1/sqrt(H)))
# ----------------------------------------------------------------------------
def init_params(key, vocab, n_hidden, n_layers):
    params = {"lstm": []}
    bound = 1.0 / jnp.sqrt(jnp.float32(n_hidden))
    for l in range(n_layers):
        d_in = vocab if l == 0 else n_hidden
        key, k1, k2, k3, k4 = jax.random.split(key, 5)
        w_ih = jax.random.uniform(k1, (4 * n_hidden, d_in), jnp.float32,
                                  -bound, bound)
        w_hh = jax.random.uniform(k2, (4 * n_hidden, n_hidden), jnp.float32,
                                  -bound, bound)
        b_ih = jax.random.uniform(k3, (4 * n_hidden,), jnp.float32,
                                  -bound, bound)
        b_hh = jax.random.uniform(k4, (4 * n_hidden,), jnp.float32,
                                  -bound, bound)
        params["lstm"].append({
            "w_ih_t": w_ih.T,                              # (d_in, 4H)
            "w_hh_t": w_hh.T,                              # (H, 4H)
            "b": (b_ih + b_hh).reshape(1, 4 * n_hidden),   # (1, 4H)
        })
    key, k1, k2 = jax.random.split(key, 3)
    fc_bound = 1.0 / jnp.sqrt(jnp.float32(n_hidden))
    w_fc = jax.random.uniform(k1, (vocab, n_hidden), jnp.float32,
                              -fc_bound, fc_bound)
    b_fc = jax.random.uniform(k2, (vocab,), jnp.float32, -fc_bound, fc_bound)
    params["fc"] = {"w_t": w_fc.T, "b": b_fc.reshape(1, vocab)}
    return params


if __name__ == "__main__":
    vocab = 16          # len(tokens)
    n_hidden = 32
    n_layers = 2
    batch = 2
    seq = 8

    key = jax.random.PRNGKey(0)
    key, kp, kx = jax.random.split(key, 3)
    params = init_params(kp, vocab, n_hidden, n_layers)

    # one-hot encoded character input, batch_first: (B, T, vocab)
    ids = jax.random.randint(kx, (batch, seq), 0, vocab)
    x = jax.nn.one_hot(ids, vocab, dtype=jnp.float32)

    # init_hidden(batch_size): zeros of shape (n_layers, B, H)
    h0 = jnp.zeros((n_layers, batch, n_hidden), jnp.float32)
    c0 = jnp.zeros((n_layers, batch, n_hidden), jnp.float32)

    out, (h_n, c_n) = char_rnn_forward(x, (h0, c0), params)
    jax.block_until_ready((out, h_n, c_n))

    # sanity check vs pure-JAX reference (same bf16 dot-boundary casts)
    ref_out, (ref_h, ref_c) = char_rnn_reference(x, (h0, c0), params)
    assert out.shape == (batch * seq, vocab)
    assert h_n.shape == (n_layers, batch, n_hidden)
    assert c_n.shape == (n_layers, batch, n_hidden)
    assert jnp.allclose(out, ref_out, rtol=1e-4, atol=1e-4)
    assert jnp.allclose(h_n, ref_h, rtol=1e-4, atol=1e-4)
    assert jnp.allclose(c_n, ref_c, rtol=1e-4, atol=1e-4)

    print("KERNEL_OK")
</pallas_src>

<mosaic_0001>
module attributes {stable_mosaic.version = 11 : i64} {
  func.func @kernel(%arg0: memref<2x8x16xbf16, #tpu.memory_space<vmem>>, %arg1: memref<16x128xbf16, #tpu.memory_space<vmem>>, %arg2: memref<32x128xbf16, #tpu.memory_space<vmem>>, %arg3: memref<1x128xf32, #tpu.memory_space<vmem>>, %arg4: memref<64x128xbf16, #tpu.memory_space<vmem>>, %arg5: memref<1x128xf32, #tpu.memory_space<vmem>>, %arg6: memref<32x128xbf16, #tpu.memory_space<vmem>>, %arg7: memref<1x128xf32, #tpu.memory_space<vmem>>, %arg8: memref<2x2x32xf32, #tpu.memory_space<vmem>>, %arg9: memref<2x2x32xf32, #tpu.memory_space<vmem>>, %arg10: memref<16x128xf32, #tpu.memory_space<vmem>>, %arg11: memref<2x2x32xf32, #tpu.memory_space<vmem>>, %arg12: memref<2x2x32xf32, #tpu.memory_space<vmem>>, %arg13: memref<2x8x32xf32, #tpu.memory_space<vmem>>) attributes {dimension_semantics = [], scalar_prefetch = 0 : i64, scratch_operands = 1 : i64, tpu.core_type = #tpu.core_type<tc>} {
    %c0 = arith.constant 0 : index
    %c0_0 = arith.constant 0 : index
    %c0_1 = arith.constant 0 : index
    %0 = vector.load %arg0[%c0, %c0_0, %c0_1] : memref<2x8x16xbf16, #tpu.memory_space<vmem>>, vector<2x8x16xbf16>
    %1 = vector.shape_cast %0 : vector<2x8x16xbf16> to vector<16x16xbf16>
    %c0_2 = arith.constant 0 : index
    %c0_3 = arith.constant 0 : index
    %2 = vector.load %arg1[%c0_2, %c0_3] : memref<16x128xbf16, #tpu.memory_space<vmem>>, vector<16x128xbf16>
    %cst = arith.constant dense<0.000000e+00> : vector<16x128xf32>
    %3 = tpu.matmul %1, %2, %cst {dimension_numbers = #tpu.dot_dimension_numbers<[1], [0], [0], [1], [0, 0, 1, 1], [], []>} : vector<16x16xbf16>, vector<16x128xbf16>, vector<16x128xf32> -> vector<16x128xf32>
    %c0_4 = arith.constant 0 : index
    %c0_5 = arith.constant 0 : index
    %4 = vector.load %arg3[%c0_4, %c0_5] : memref<1x128xf32, #tpu.memory_space<vmem>>, vector<1x128xf32>
    %5 = vector.broadcast %4 : vector<1x128xf32> to vector<16x128xf32>
    %6 = arith.addf %3, %5 : vector<16x128xf32>
    %7 = vector.shape_cast %6 : vector<16x128xf32> to vector<2x8x128xf32>
    %c0_6 = arith.constant 0 : index
    %c0_7 = arith.constant 0 : index
    %8 = vector.load %arg2[%c0_6, %c0_7] : memref<32x128xbf16, #tpu.memory_space<vmem>>, vector<32x128xbf16>
    %c0_8 = arith.constant 0 : index
    %c0_9 = arith.constant 0 : index
    %9 = vector.load %arg4[%c0_8, %c0_9] : memref<64x128xbf16, #tpu.memory_space<vmem>>, vector<64x128xbf16>
    %c0_10 = arith.constant 0 : index
    %c0_11 = arith.constant 0 : index
    %10 = vector.load %arg5[%c0_10, %c0_11] : memref<1x128xf32, #tpu.memory_space<vmem>>, vector<1x128xf32>
    %c0_12 = arith.constant 0 : index
    %c0_13 = arith.constant 0 : index
    %c0_14 = arith.constant 0 : index
    %11 = vector.load %arg8[%c0_12, %c0_13, %c0_14] : memref<2x2x32xf32, #tpu.memory_space<vmem>>, vector<1x2x32xf32>
    %12 = vector.shape_cast %11 : vector<1x2x32xf32> to vector<2x32xf32>
    %c1 = arith.constant 1 : index
    %c0_15 = arith.constant 0 : index
    %c0_16 = arith.constant 0 : index
    %13 = vector.load %arg8[%c1, %c0_15, %c0_16] : memref<2x2x32xf32, #tpu.memory_space<vmem>>, vector<1x2x32xf32>
    %14 = vector.shape_cast %13 : vector<1x2x32xf32> to vector<2x32xf32>
    %c0_17 = arith.constant 0 : index
    %c0_18 = arith.constant 0 : index
    %c0_19 = arith.constant 0 : index
    %15 = vector.load %arg9[%c0_17, %c0_18, %c0_19] : memref<2x2x32xf32, #tpu.memory_space<vmem>>, vector<1x2x32xf32>
    %16 = vector.shape_cast %15 : vector<1x2x32xf32> to vector<2x32xf32>
    %c1_20 = arith.constant 1 : index
    %c0_21 = arith.constant 0 : index
    %c0_22 = arith.constant 0 : index
    %17 = vector.load %arg9[%c1_20, %c0_21, %c0_22] : memref<2x2x32xf32, #tpu.memory_space<vmem>>, vector<1x2x32xf32>
    %18 = vector.shape_cast %17 : vector<1x2x32xf32> to vector<2x32xf32>
    %19 = vector.extract_strided_slice %7 {offsets = [0, 0, 0], sizes = [2, 1, 128], strides = [1, 1, 1]} : vector<2x8x128xf32> to vector<2x1x128xf32>
    %20 = vector.shape_cast %19 : vector<2x1x128xf32> to vector<2x128xf32>
    %21 = arith.truncf %12 : vector<2x32xf32> to vector<2x32xbf16>
    %cst_23 = arith.constant dense<0.000000e+00> : vector<2x128xf32>
    %22 = tpu.matmul %21, %8, %cst_23 {dimension_numbers = #tpu.dot_dimension_numbers<[1], [0], [0], [1], [0, 0, 1, 1], [], []>} : vector<2x32xbf16>, vector<32x128xbf16>, vector<2x128xf32> -> vector<2x128xf32>
    %23 = arith.addf %20, %22 : vector<2x128xf32>
    %24 = arith.negf %23 : vector<2x128xf32>
    %25 = math.exp %24 : vector<2x128xf32>
    %cst_24 = arith.constant 1.000000e+00 : f32
    %26 = vector.broadcast %cst_24 : f32 to vector<2x128xf32>
    %27 = arith.addf %26, %25 : vector<2x128xf32>
    %28 = arith.divf %26, %27 : vector<2x128xf32>
    %29 = math.tanh %23 : vector<2x128xf32>
    %30 = vector.extract_strided_slice %28 {offsets = [0, 0], sizes = [2, 32], strides = [1, 1]} : vector<2x128xf32> to vector<2x32xf32>
    %31 = vector.extract_strided_slice %28 {offsets = [0, 32], sizes = [2, 32], strides = [1, 1]} : vector<2x128xf32> to vector<2x32xf32>
    %32 = vector.extract_strided_slice %29 {offsets = [0, 64], sizes = [2, 32], strides = [1, 1]} : vector<2x128xf32> to vector<2x32xf32>
    %33 = vector.extract_strided_slice %28 {offsets = [0, 96], sizes = [2, 32], strides = [1, 1]} : vector<2x128xf32> to vector<2x32xf32>
    %34 = arith.mulf %31, %16 : vector<2x32xf32>
    %35 = arith.mulf %30, %32 : vector<2x32xf32>
    %36 = arith.addf %34, %35 : vector<2x32xf32>
    %37 = math.tanh %36 : vector<2x32xf32>
    %38 = arith.mulf %33, %37 : vector<2x32xf32>
    %39 = vector.extract_strided_slice %7 {offsets = [0, 1, 0], sizes = [2, 1, 128], strides = [1, 1, 1]} : vector<2x8x128xf32> to vector<2x1x128xf32>
    %40 = vector.shape_cast %39 : vector<2x1x128xf32> to vector<2x128xf32>
    %41 = arith.truncf %38 : vector<2x32xf32> to vector<2x32xbf16>
    %cst_25 = arith.constant dense<0.000000e+00> : vector<2x128xf32>
    %42 = tpu.matmul %41, %8, %cst_25 {dimension_numbers = #tpu.dot_dimension_numbers<[1], [0], [0], [1], [0, 0, 1, 1], [], []>} : vector<2x32xbf16>, vector<32x128xbf16>, vector<2x128xf32> -> vector<2x128xf32>
    %43 = arith.addf %40, %42 : vector<2x128xf32>
    %44 = tpu.concatenate %38, %14 in 1 : vector<2x32xf32>, vector<2x32xf32> -> vector<2x64xf32>
    %45 = arith.truncf %44 : vector<2x64xf32> to vector<2x64xbf16>
    %cst_26 = arith.constant dense<0.000000e+00> : vector<2x128xf32>
    %46 = tpu.matmul %45, %9, %cst_26 {dimension_numbers = #tpu.dot_dimension_numbers<[1], [0], [0], [1], [0, 0, 1, 1], [], []>} : vector<2x64xbf16>, vector<64x128xbf16>, vector<2x128xf32> -> vector<2x128xf32>
    %47 = vector.broadcast %10 : vector<1x128xf32> to vector<2x128xf32>
    %48 = arith.addf %46, %47 : vector<2x128xf32>
    %49 = arith.negf %43 : vector<2x128xf32>
    %50 = math.exp %49 : vector<2x128xf32>
    %cst_27 = arith.constant 1.000000e+00 : f32
    %51 = vector.broadcast %cst_27 : f32 to vector<2x128xf32>
    %52 = arith.addf %51, %50 : vector<2x128xf32>
    %53 = arith.divf %51, %52 : vector<2x128xf32>
    %54 = math.tanh %43 : vector<2x128xf32>
    %55 = vector.extract_strided_slice %53 {offsets = [0, 0], sizes = [2, 32], strides = [1, 1]} : vector<2x128xf32> to vector<2x32xf32>
    %56 = vector.extract_strided_slice %53 {offsets = [0, 32], sizes = [2, 32], strides = [1, 1]} : vector<2x128xf32> to vector<2x32xf32>
    %57 = vector.extract_strided_slice %54 {offsets = [0, 64], sizes = [2, 32], strides = [1, 1]} : vector<2x128xf32> to vector<2x32xf32>
    %58 = vector.extract_strided_slice %53 {offsets = [0, 96], sizes = [2, 32], strides = [1, 1]} : vector<2x128xf32> to vector<2x32xf32>
    %59 = arith.mulf %56, %36 : vector<2x32xf32>
    %60 = arith.mulf %55, %57 : vector<2x32xf32>
    %61 = arith.addf %59, %60 : vector<2x32xf32>
    %62 = math.tanh %61 : vector<2x32xf32>
    %63 = arith.mulf %58, %62 : vector<2x32xf32>
    %64 = arith.negf %48 : vector<2x128xf32>
    %65 = math.exp %64 : vector<2x128xf32>
    %cst_28 = arith.constant 1.000000e+00 : f32
    %66 = vector.broadcast %cst_28 : f32 to vector<2x128xf32>
    %67 = arith.addf %66, %65 : vector<2x128xf32>
    %68 = arith.divf %66, %67 : vector<2x128xf32>
    %69 = math.tanh %48 : vector<2x128xf32>
    %70 = vector.extract_strided_slice %68 {offsets = [0, 0], sizes = [2, 32], strides = [1, 1]} : vector<2x128xf32> to vector<2x32xf32>
    %71 = vector.extract_strided_slice %68 {offsets = [0, 32], sizes = [2, 32], strides = [1, 1]} : vector<2x128xf32> to vector<2x32xf32>
    %72 = vector.extract_strided_slice %69 {offsets = [0, 64], sizes = [2, 32], strides = [1, 1]} : vector<2x128xf32> to vector<2x32xf32>
    %73 = vector.extract_strided_slice %68 {offsets = [0, 96], sizes = [2, 32], strides = [1, 1]} : vector<2x128xf32> to vector<2x32xf32>
    %74 = arith.mulf %71, %18 : vector<2x32xf32>
    %75 = arith.mulf %70, %72 : vector<2x32xf32>
    %76 = arith.addf %74, %75 : vector<2x32xf32>
    %77 = math.tanh %76 : vector<2x32xf32>
    %78 = arith.mulf %73, %77 : vector<2x32xf32>
    %c0_29 = arith.constant 0 : index
    %c0_30 = arith.constant 0 : index
    %c0_31 = arith.constant 0 : index
    %79 = vector.load %arg13[%c0_29, %c0_30, %c0_31] : memref<2x8x32xf32, #tpu.memory_space<vmem>>, vector<2x1x32xf32>
    %80 = vector.shape_cast %79 : vector<2x1x32xf32> to vector<2x32xf32>
    %81 = vector.shape_cast %78 : vector<2x32xf32> to vector<2x1x32xf32>
    tpu.vector_store %arg13[%c0_29, %c0_30, %c0_31], %81 {strides = array<i32>} : memref<2x8x32xf32, #tpu.memory_space<vmem>>, vector<2x1x32xf32>,
    %82 = vector.extract_strided_slice %7 {offsets = [0, 2, 0], sizes = [2, 1, 128], strides = [1, 1, 1]} : vector<2x8x128xf32> to vector<2x1x128xf32>
    %83 = vector.shape_cast %82 : vector<2x1x128xf32> to vector<2x128xf32>
    %84 = arith.truncf %63 : vector<2x32xf32> to vector<2x32xbf16>
    %cst_32 = arith.constant dense<0.000000e+00> : vector<2x128xf32>
    %85 = tpu.matmul %84, %8, %cst_32 {dimension_numbers = #tpu.dot_dimension_numbers<[1], [0], [0], [1], [0, 0, 1, 1], [], []>} : vector<2x32xbf16>, vector<32x128xbf16>, vector<2x128xf32> -> vector<2x128xf32>
    %86 = arith.addf %83, %85 : vector<2x128xf32>
    %87 = tpu.concatenate %63, %78 in 1 : vector<2x32xf32>, vector<2x32xf32> -> vector<2x64xf32>
    %88 = arith.truncf %87 : vector<2x64xf32> to vector<2x64xbf16>
    %cst_33 = arith.constant dense<0.000000e+00> : vector<2x128xf32>
    %89 = tpu.matmul %88, %9, %cst_33 {dimension_numbers = #tpu.dot_dimension_numbers<[1], [0], [0], [1], [0, 0, 1, 1], [], []>} : vector<2x64xbf16>, vector<64x128xbf16>, vector<2x128xf32> -> vector<2x128xf32>
    %90 = vector.broadcast %10 : vector<1x128xf32> to vector<2x128xf32>
    %91 = arith.addf %89, %90 : vector<2x128xf32>
    %92 = arith.negf %86 : vector<2x128xf32>
    %93 = math.exp %92 : vector<2x128xf32>
    %cst_34 = arith.constant 1.000000e+00 : f32
    %94 = vector.broadcast %cst_34 : f32 to vector<2x128xf32>
    %95 = arith.addf %94, %93 : vector<2x128xf32>
    %96 = arith.divf %94, %95 : vector<2x128xf32>
    %97 = math.tanh %86 : vector<2x128xf32>
    %98 = vector.extract_strided_slice %96 {offsets = [0, 0], sizes = [2, 32], strides = [1, 1]} : vector<2x128xf32> to vector<2x32xf32>
    %99 = vector.extract_strided_slice %96 {offsets = [0, 32], sizes = [2, 32], strides = [1, 1]} : vector<2x128xf32> to vector<2x32xf32>
    %100 = vector.extract_strided_slice %97 {offsets = [0, 64], sizes = [2, 32], strides = [1, 1]} : vector<2x128xf32> to vector<2x32xf32>
    %101 = vector.extract_strided_slice %96 {offsets = [0, 96], sizes = [2, 32], strides = [1, 1]} : vector<2x128xf32> to vector<2x32xf32>
    %102 = arith.mulf %99, %61 : vector<2x32xf32>
    %103 = arith.mulf %98, %100 : vector<2x32xf32>
    %104 = arith.addf %102, %103 : vector<2x32xf32>
    %105 = math.tanh %104 : vector<2x32xf32>
    %106 = arith.mulf %101, %105 : vector<2x32xf32>
    %107 = arith.negf %91 : vector<2x128xf32>
    %108 = math.exp %107 : vector<2x128xf32>
    %cst_35 = arith.constant 1.000000e+00 : f32
    %109 = vector.broadcast %cst_35 : f32 to vector<2x128xf32>
    %110 = arith.addf %109, %108 : vector<2x128xf32>
    %111 = arith.divf %109, %110 : vector<2x128xf32>
    %112 = math.tanh %91 : vector<2x128xf32>
    %113 = vector.extract_strided_slice %111 {offsets = [0, 0], sizes = [2, 32], strides = [1, 1]} : vector<2x128xf32> to vector<2x32xf32>
    %114 = vector.extract_strided_slice %111 {offsets = [0, 32], sizes = [2, 32], strides = [1, 1]} : vector<2x128xf32> to vector<2x32xf32>
    %115 = vector.extract_strided_slice %112 {offsets = [0, 64], sizes = [2, 32], strides = [1, 1]} : vector<2x128xf32> to vector<2x32xf32>
    %116 = vector.extract_strided_slice %111 {offsets = [0, 96], sizes = [2, 32], strides = [1, 1]} : vector<2x128xf32> to vector<2x32xf32>
    %117 = arith.mulf %114, %76 : vector<2x32xf32>
    %118 = arith.mulf %113, %115 : vector<2x32xf32>
    %119 = arith.addf %117, %118 : vector<2x32xf32>
    %120 = math.tanh %119 : vector<2x32xf32>
    %121 = arith.mulf %116, %120 : vector<2x32xf32>
    %c0_36 = arith.constant 0 : index
    %c1_37 = arith.constant 1 : index
    %c0_38 = arith.constant 0 : index
    %122 = vector.load %arg13[%c0_36, %c1_37, %c0_38] : memref<2x8x32xf32, #tpu.memory_space<vmem>>, vector<2x1x32xf32>
    %123 = vector.shape_cast %122 : vector<2x1x32xf32> to vector<2x32xf32>
    %124 = vector.shape_cast %121 : vector<2x32xf32> to vector<2x1x32xf32>
    tpu.vector_store %arg13[%c0_36, %c1_37, %c0_38], %124 {strides = array<i32>} : memref<2x8x32xf32, #tpu.memory_space<vmem>>, vector<2x1x32xf32>,
    %125 = vector.extract_strided_slice %7 {offsets = [0, 3, 0], sizes = [2, 1, 128], strides = [1, 1, 1]} : vector<2x8x128xf32> to vector<2x1x128xf32>
    %126 = vector.shape_cast %125 : vector<2x1x128xf32> to vector<2x128xf32>
    %127 = arith.truncf %106 : vector<2x32xf32> to vector<2x32xbf16>
    %cst_39 = arith.constant dense<0.000000e+00> : vector<2x128xf32>
    %128 = tpu.matmul %127, %8, %cst_39 {dimension_numbers = #tpu.dot_dimension_numbers<[1], [0], [0], [1], [0, 0, 1, 1], [], []>} : vector<2x32xbf16>, vector<32x128xbf16>, vector<2x128xf32> -> vector<2x128xf32>
    %129 = arith.addf %126, %128 : vector<2x128xf32>
    %130 = tpu.concatenate %106, %121 in 1 : vector<2x32xf32>, vector<2x32xf32> -> vector<2x64xf32>
    %131 = arith.truncf %130 : vector<2x64xf32> to vector<2x64xbf16>
    %cst_40 = arith.constant dense<0.000000e+00> : vector<2x128xf32>
    %132 = tpu.matmul %131, %9, %cst_40 {dimension_numbers = #tpu.dot_dimension_numbers<[1], [0], [0], [1], [0, 0, 1, 1], [], []>} : vector<2x64xbf16>, vector<64x128xbf16>, vector<2x128xf32> -> vector<2x128xf32>
    %133 = vector.broadcast %10 : vector<1x128xf32> to vector<2x128xf32>
    %134 = arith.addf %132, %133 : vector<2x128xf32>
    %135 = arith.negf %129 : vector<2x128xf32>
    %136 = math.exp %135 : vector<2x128xf32>
    %cst_41 = arith.constant 1.000000e+00 : f32
    %137 = vector.broadcast %cst_41 : f32 to vector<2x128xf32>
    %138 = arith.addf %137, %136 : vector<2x128xf32>
    %139 = arith.divf %137, %138 : vector<2x128xf32>
    %140 = math.tanh %129 : vector<2x128xf32>
    %141 = vector.extract_strided_slice %139 {offsets = [0, 0], sizes = [2, 32], strides = [1, 1]} : vector<2x128xf32> to vector<2x32xf32>
    %142 = vector.extract_strided_slice %139 {offsets = [0, 32], sizes = [2, 32], strides = [1, 1]} : vector<2x128xf32> to vector<2x32xf32>
    %143 = vector.extract_strided_slice %140 {offsets = [0, 64], sizes = [2, 32], strides = [1, 1]} : vector<2x128xf32> to vector<2x32xf32>
    %144 = vector.extract_strided_slice %139 {offsets = [0, 96], sizes = [2, 32], strides = [1, 1]} : vector<2x128xf32> to vector<2x32xf32>
    %145 = arith.mulf %142, %104 : vector<2x32xf32>
    %146 = arith.mulf %141, %143 : vector<2x32xf32>
    %147 = arith.addf %145, %146 : vector<2x32xf32>
    %148 = math.tanh %147 : vector<2x32xf32>
    %149 = arith.mulf %144, %148 : vector<2x32xf32>
    %150 = arith.negf %134 : vector<2x128xf32>
    %151 = math.exp %150 : vector<2x128xf32>
    %cst_42 = arith.constant 1.000000e+00 : f32
    %152 = vector.broadcast %cst_42 : f32 to vector<2x128xf32>
    %153 = arith.addf %152, %151 : vector<2x128xf32>
    %154 = arith.divf %152, %153 : vector<2x128xf32>
    %155 = math.tanh %134 : vector<2x128xf32>
    %156 = vector.extract_strided_slice %154 {offsets = [0, 0], sizes = [2, 32], strides = [1, 1]} : vector<2x128xf32> to vector<2x32xf32>
    %157 = vector.extract_strided_slice %154 {offsets = [0, 32], sizes = [2, 32], strides = [1, 1]} : vector<2x128xf32> to vector<2x32xf32>
    %158 = vector.extract_strided_slice %155 {offsets = [0, 64], sizes = [2, 32], strides = [1, 1]} : vector<2x128xf32> to vector<2x32xf32>
    %159 = vector.extract_strided_slice %154 {offsets = [0, 96], sizes = [2, 32], strides = [1, 1]} : vector<2x128xf32> to vector<2x32xf32>
    %160 = arith.mulf %157, %119 : vector<2x32xf32>
    %161 = arith.mulf %156, %158 : vector<2x32xf32>
    %162 = arith.addf %160, %161 : vector<2x32xf32>
    %163 = math.tanh %162 : vector<2x32xf32>
    %164 = arith.mulf %159, %163 : vector<2x32xf32>
    %c0_43 = arith.constant 0 : index
    %c2 = arith.constant 2 : index
    %c0_44 = arith.constant 0 : index
    %165 = vector.load %arg13[%c0_43, %c2, %c0_44] : memref<2x8x32xf32, #tpu.memory_space<vmem>>, vector<2x1x32xf32>
    %166 = vector.shape_cast %165 : vector<2x1x32xf32> to vector<2x32xf32>
    %167 = vector.shape_cast %164 : vector<2x32xf32> to vector<2x1x32xf32>
    tpu.vector_store %arg13[%c0_43, %c2, %c0_44], %167 {strides = array<i32>} : memref<2x8x32xf32, #tpu.memory_space<vmem>>, vector<2x1x32xf32>,
    %168 = vector.extract_strided_slice %7 {offsets = [0, 4, 0], sizes = [2, 1, 128], strides = [1, 1, 1]} : vector<2x8x128xf32> to vector<2x1x128xf32>
    %169 = vector.shape_cast %168 : vector<2x1x128xf32> to vector<2x128xf32>
    %170 = arith.truncf %149 : vector<2x32xf32> to vector<2x32xbf16>
    %cst_45 = arith.constant dense<0.000000e+00> : vector<2x128xf32>
    %171 = tpu.matmul %170, %8, %cst_45 {dimension_numbers = #tpu.dot_dimension_numbers<[1], [0], [0], [1], [0, 0, 1, 1], [], []>} : vector<2x32xbf16>, vector<32x128xbf16>, vector<2x128xf32> -> vector<2x128xf32>
    %172 = arith.addf %169, %171 : vector<2x128xf32>
    %173 = tpu.concatenate %149, %164 in 1 : vector<2x32xf32>, vector<2x32xf32> -> vector<2x64xf32>
    %174 = arith.truncf %173 : vector<2x64xf32> to vector<2x64xbf16>
    %cst_46 = arith.constant dense<0.000000e+00> : vector<2x128xf32>
    %175 = tpu.matmul %174, %9, %cst_46 {dimension_numbers = #tpu.dot_dimension_numbers<[1], [0], [0], [1], [0, 0, 1, 1], [], []>} : vector<2x64xbf16>, vector<64x128xbf16>, vector<2x128xf32> -> vector<2x128xf32>
    %176 = vector.broadcast %10 : vector<1x128xf32> to vector<2x128xf32>
    %177 = arith.addf %175, %176 : vector<2x128xf32>
    %178 = arith.negf %172 : vector<2x128xf32>
    %179 = math.exp %178 : vector<2x128xf32>
    %cst_47 = arith.constant 1.000000e+00 : f32
    %180 = vector.broadcast %cst_47 : f32 to vector<2x128xf32>
    %181 = arith.addf %180, %179 : vector<2x128xf32>
    %182 = arith.divf %180, %181 : vector<2x128xf32>
    %183 = math.tanh %172 : vector<2x128xf32>
    %184 = vector.extract_strided_slice %182 {offsets = [0, 0], sizes = [2, 32], strides = [1, 1]} : vector<2x128xf32> to vector<2x32xf32>
    %185 = vector.extract_strided_slice %182 {offsets = [0, 32], sizes = [2, 32], strides = [1, 1]} : vector<2x128xf32> to vector<2x32xf32>
    %186 = vector.extract_strided_slice %183 {offsets = [0, 64], sizes = [2, 32], strides = [1, 1]} : vector<2x128xf32> to vector<2x32xf32>
    %187 = vector.extract_strided_slice %182 {offsets = [0, 96], sizes = [2, 32], strides = [1, 1]} : vector<2x128xf32> to vector<2x32xf32>
    %188 = arith.mulf %185, %147 : vector<2x32xf32>
    %189 = arith.mulf %184, %186 : vector<2x32xf32>
    %190 = arith.addf %188, %189 : vector<2x32xf32>
    %191 = math.tanh %190 : vector<2x32xf32>
    %192 = arith.mulf %187, %191 : vector<2x32xf32>
    %193 = arith.negf %177 : vector<2x128xf32>
    %194 = math.exp %193 : vector<2x128xf32>
    %cst_48 = arith.constant 1.000000e+00 : f32
    %195 = vector.broadcast %cst_48 : f32 to vector<2x128xf32>
    %196 = arith.addf %195, %194 : vector<2x128xf32>
    %197 = arith.divf %195, %196 : vector<2x128xf32>
    %198 = math.tanh %177 : vector<2x128xf32>
    %199 = vector.extract_strided_slice %197 {offsets = [0, 0], sizes = [2, 32], strides = [1, 1]} : vector<2x128xf32> to vector<2x32xf32>
    %200 = vector.extract_strided_slice %197 {offsets = [0, 32], sizes = [2, 32], strides = [1, 1]} : vector<2x128xf32> to vector<2x32xf32>
    %201 = vector.extract_strided_slice %198 {offsets = [0, 64], sizes = [2, 32], strides = [1, 1]} : vector<2x128xf32> to vector<2x32xf32>
    %202 = vector.extract_strided_slice %197 {offsets = [0, 96], sizes = [2, 32], strides = [1, 1]} : vector<2x128xf32> to vector<2x32xf32>
    %203 = arith.mulf %200, %162 : vector<2x32xf32>
    %204 = arith.mulf %199, %201 : vector<2x32xf32>
    %205 = arith.addf %203, %204 : vector<2x32xf32>
    %206 = math.tanh %205 : vector<2x32xf32>
    %207 = arith.mulf %202, %206 : vector<2x32xf32>
    %c0_49 = arith.constant 0 : index
    %c3 = arith.constant 3 : index
    %c0_50 = arith.constant 0 : index
    %208 = vector.load %arg13[%c0_49, %c3, %c0_50] : memref<2x8x32xf32, #tpu.memory_space<vmem>>, vector<2x1x32xf32>
    %209 = vector.shape_cast %208 : vector<2x1x32xf32> to vector<2x32xf32>
    %210 = vector.shape_cast %207 : vector<2x32xf32> to vector<2x1x32xf32>
    tpu.vector_store %arg13[%c0_49, %c3, %c0_50], %210 {strides = array<i32>} : memref<2x8x32xf32, #tpu.memory_space<vmem>>, vector<2x1x32xf32>,
    %211 = vector.extract_strided_slice %7 {offsets = [0, 5, 0], sizes = [2, 1, 128], strides = [1, 1, 1]} : vector<2x8x128xf32> to vector<2x1x128xf32>
    %212 = vector.shape_cast %211 : vector<2x1x128xf32> to vector<2x128xf32>
    %213 = arith.truncf %192 : vector<2x32xf32> to vector<2x32xbf16>
    %cst_51 = arith.constant dense<0.000000e+00> : vector<2x128xf32>
    %214 = tpu.matmul %213, %8, %cst_51 {dimension_numbers = #tpu.dot_dimension_numbers<[1], [0], [0], [1], [0, 0, 1, 1], [], []>} : vector<2x32xbf16>, vector<32x128xbf16>, vector<2x128xf32> -> vector<2x128xf32>
    %215 = arith.addf %212, %214 : vector<2x128xf32>
    %216 = tpu.concatenate %192, %207 in 1 : vector<2x32xf32>, vector<2x32xf32> -> vector<2x64xf32>
    %217 = arith.truncf %216 : vector<2x64xf32> to vector<2x64xbf16>
    %cst_52 = arith.constant dense<0.000000e+00> : vector<2x128xf32>
    %218 = tpu.matmul %217, %9, %cst_52 {dimension_numbers = #tpu.dot_dimension_numbers<[1], [0], [0], [1], [0, 0, 1, 1], [], []>} : vector<2x64xbf16>, vector<64x128xbf16>, vector<2x128xf32> -> vector<2x128xf32>
    %219 = vector.broadcast %10 : vector<1x128xf32> to vector<2x128xf32>
    %220 = arith.addf %218, %219 : vector<2x128xf32>
    %221 = arith.negf %215 : vector<2x128xf32>
    %222 = math.exp %221 : vector<2x128xf32>
    %cst_53 = arith.constant 1.000000e+00 : f32
    %223 = vector.broadcast %cst_53 : f32 to vector<2x128xf32>
    %224 = arith.addf %223, %222 : vector<2x128xf32>
    %225 = arith.divf %223, %224 : vector<2x128xf32>
    %226 = math.tanh %215 : vector<2x128xf32>
    %227 = vector.extract_strided_slice %225 {offsets = [0, 0], sizes = [2, 32], strides = [1, 1]} : vector<2x128xf32> to vector<2x32xf32>
    %228 = vector.extract_strided_slice %225 {offsets = [0, 32], sizes = [2, 32], strides = [1, 1]} : vector<2x128xf32> to vector<2x32xf32>
    %229 = vector.extract_strided_slice %226 {offsets = [0, 64], sizes = [2, 32], strides = [1, 1]} : vector<2x128xf32> to vector<2x32xf32>
    %230 = vector.extract_strided_slice %225 {offsets = [0, 96], sizes = [2, 32], strides = [1, 1]} : vector<2x128xf32> to vector<2x32xf32>
    %231 = arith.mulf %228, %190 : vector<2x32xf32>
    %232 = arith.mulf %227, %229 : vector<2x32xf32>
    %233 = arith.addf %231, %232 : vector<2x32xf32>
    %234 = math.tanh %233 : vector<2x32xf32>
    %235 = arith.mulf %230, %234 : vector<2x32xf32>
    %236 = arith.negf %220 : vector<2x128xf32>
    %237 = math.exp %236 : vector<2x128xf32>
    %cst_54 = arith.constant 1.000000e+00 : f32
    %238 = vector.broadcast %cst_54 : f32 to vector<2x128xf32>
    %239 = arith.addf %238, %237 : vector<2x128xf32>
    %240 = arith.divf %238, %239 : vector<2x128xf32>
    %241 = math.tanh %220 : vector<2x128xf32>
    %242 = vector.extract_strided_slice %240 {offsets = [0, 0], sizes = [2, 32], strides = [1, 1]} : vector<2x128xf32> to vector<2x32xf32>
    %243 = vector.extract_strided_slice %240 {offsets = [0, 32], sizes = [2, 32], strides = [1, 1]} : vector<2x128xf32> to vector<2x32xf32>
    %244 = vector.extract_strided_slice %241 {offsets = [0, 64], sizes = [2, 32], strides = [1, 1]} : vector<2x128xf32> to vector<2x32xf32>
    %245 = vector.extract_strided_slice %240 {offsets = [0, 96], sizes = [2, 32], strides = [1, 1]} : vector<2x128xf32> to vector<2x32xf32>
    %246 = arith.mulf %243, %205 : vector<2x32xf32>
    %247 = arith.mulf %242, %244 : vector<2x32xf32>
    %248 = arith.addf %246, %247 : vector<2x32xf32>
    %249 = math.tanh %248 : vector<2x32xf32>
    %250 = arith.mulf %245, %249 : vector<2x32xf32>
    %c0_55 = arith.constant 0 : index
    %c4 = arith.constant 4 : index
    %c0_56 = arith.constant 0 : index
    %251 = vector.load %arg13[%c0_55, %c4, %c0_56] : memref<2x8x32xf32, #tpu.memory_space<vmem>>, vector<2x1x32xf32>
    %252 = vector.shape_cast %251 : vector<2x1x32xf32> to vector<2x32xf32>
    %253 = vector.shape_cast %250 : vector<2x32xf32> to vector<2x1x32xf32>
    tpu.vector_store %arg13[%c0_55, %c4, %c0_56], %253 {strides = array<i32>} : memref<2x8x32xf32, #tpu.memory_space<vmem>>, vector<2x1x32xf32>,
    %254 = vector.extract_strided_slice %7 {offsets = [0, 6, 0], sizes = [2, 1, 128], strides = [1, 1, 1]} : vector<2x8x128xf32> to vector<2x1x128xf32>
    %255 = vector.shape_cast %254 : vector<2x1x128xf32> to vector<2x128xf32>
    %256 = arith.truncf %235 : vector<2x32xf32> to vector<2x32xbf16>
    %cst_57 = arith.constant dense<0.000000e+00> : vector<2x128xf32>
    %257 = tpu.matmul %256, %8, %cst_57 {dimension_numbers = #tpu.dot_dimension_numbers<[1], [0], [0], [1], [0, 0, 1, 1], [], []>} : vector<2x32xbf16>, vector<32x128xbf16>, vector<2x128xf32> -> vector<2x128xf32>
    %258 = arith.addf %255, %257 : vector<2x128xf32>
    %259 = tpu.concatenate %235, %250 in 1 : vector<2x32xf32>, vector<2x32xf32> -> vector<2x64xf32>
    %260 = arith.truncf %259 : vector<2x64xf32> to vector<2x64xbf16>
    %cst_58 = arith.constant dense<0.000000e+00> : vector<2x128xf32>
    %261 = tpu.matmul %260, %9, %cst_58 {dimension_numbers = #tpu.dot_dimension_numbers<[1], [0], [0], [1], [0, 0, 1, 1], [], []>} : vector<2x64xbf16>, vector<64x128xbf16>, vector<2x128xf32> -> vector<2x128xf32>
    %262 = vector.broadcast %10 : vector<1x128xf32> to vector<2x128xf32>
    %263 = arith.addf %261, %262 : vector<2x128xf32>
    %264 = arith.negf %258 : vector<2x128xf32>
    %265 = math.exp %264 : vector<2x128xf32>
    %cst_59 = arith.constant 1.000000e+00 : f32
    %266 = vector.broadcast %cst_59 : f32 to vector<2x128xf32>
    %267 = arith.addf %266, %265 : vector<2x128xf32>
    %268 = arith.divf %266, %267 : vector<2x128xf32>
    %269 = math.tanh %258 : vector<2x128xf32>
    %270 = vector.extract_strided_slice %268 {offsets = [0, 0], sizes = [2, 32], strides = [1, 1]} : vector<2x128xf32> to vector<2x32xf32>
    %271 = vector.extract_strided_slice %268 {offsets = [0, 32], sizes = [2, 32], strides = [1, 1]} : vector<2x128xf32> to vector<2x32xf32>
    %272 = vector.extract_strided_slice %269 {offsets = [0, 64], sizes = [2, 32], strides = [1, 1]} : vector<2x128xf32> to vector<2x32xf32>
    %273 = vector.extract_strided_slice %268 {offsets = [0, 96], sizes = [2, 32], strides = [1, 1]} : vector<2x128xf32> to vector<2x32xf32>
    %274 = arith.mulf %271, %233 : vector<2x32xf32>
    %275 = arith.mulf %270, %272 : vector<2x32xf32>
    %276 = arith.addf %274, %275 : vector<2x32xf32>
    %277 = math.tanh %276 : vector<2x32xf32>
    %278 = arith.mulf %273, %277 : vector<2x32xf32>
    %279 = arith.negf %263 : vector<2x128xf32>
    %280 = math.exp %279 : vector<2x128xf32>
    %cst_60 = arith.constant 1.000000e+00 : f32
    %281 = vector.broadcast %cst_60 : f32 to vector<2x128xf32>
    %282 = arith.addf %281, %280 : vector<2x128xf32>
    %283 = arith.divf %281, %282 : vector<2x128xf32>
    %284 = math.tanh %263 : vector<2x128xf32>
    %285 = vector.extract_strided_slice %283 {offsets = [0, 0], sizes = [2, 32], strides = [1, 1]} : vector<2x128xf32> to vector<2x32xf32>
    %286 = vector.extract_strided_slice %283 {offsets = [0, 32], sizes = [2, 32], strides = [1, 1]} : vector<2x128xf32> to vector<2x32xf32>
    %287 = vector.extract_strided_slice %284 {offsets = [0, 64], sizes = [2, 32], strides = [1, 1]} : vector<2x128xf32> to vector<2x32xf32>
    %288 = vector.extract_strided_slice %283 {offsets = [0, 96], sizes = [2, 32], strides = [1, 1]} : vector<2x128xf32> to vector<2x32xf32>
    %289 = arith.mulf %286, %248 : vector<2x32xf32>
    %290 = arith.mulf %285, %287 : vector<2x32xf32>
    %291 = arith.addf %289, %290 : vector<2x32xf32>
    %292 = math.tanh %291 : vector<2x32xf32>
    %293 = arith.mulf %288, %292 : vector<2x32xf32>
    %c0_61 = arith.constant 0 : index
    %c5 = arith.constant 5 : index
    %c0_62 = arith.constant 0 : index
    %294 = vector.load %arg13[%c0_61, %c5, %c0_62] : memref<2x8x32xf32, #tpu.memory_space<vmem>>, vector<2x1x32xf32>
    %295 = vector.shape_cast %294 : vector<2x1x32xf32> to vector<2x32xf32>
    %296 = vector.shape_cast %293 : vector<2x32xf32> to vector<2x1x32xf32>
    tpu.vector_store %arg13[%c0_61, %c5, %c0_62], %296 {strides = array<i32>} : memref<2x8x32xf32, #tpu.memory_space<vmem>>, vector<2x1x32xf32>,
    %297 = vector.extract_strided_slice %7 {offsets = [0, 7, 0], sizes = [2, 1, 128], strides = [1, 1, 1]} : vector<2x8x128xf32> to vector<2x1x128xf32>
    %298 = vector.shape_cast %297 : vector<2x1x128xf32> to vector<2x128xf32>
    %299 = arith.truncf %278 : vector<2x32xf32> to vector<2x32xbf16>
    %cst_63 = arith.constant dense<0.000000e+00> : vector<2x128xf32>
    %300 = tpu.matmul %299, %8, %cst_63 {dimension_numbers = #tpu.dot_dimension_numbers<[1], [0], [0], [1], [0, 0, 1, 1], [], []>} : vector<2x32xbf16>, vector<32x128xbf16>, vector<2x128xf32> -> vector<2x128xf32>
    %301 = arith.addf %298, %300 : vector<2x128xf32>
    %302 = tpu.concatenate %278, %293 in 1 : vector<2x32xf32>, vector<2x32xf32> -> vector<2x64xf32>
    %303 = arith.truncf %302 : vector<2x64xf32> to vector<2x64xbf16>
    %cst_64 = arith.constant dense<0.000000e+00> : vector<2x128xf32>
    %304 = tpu.matmul %303, %9, %cst_64 {dimension_numbers = #tpu.dot_dimension_numbers<[1], [0], [0], [1], [0, 0, 1, 1], [], []>} : vector<2x64xbf16>, vector<64x128xbf16>, vector<2x128xf32> -> vector<2x128xf32>
    %305 = vector.broadcast %10 : vector<1x128xf32> to vector<2x128xf32>
    %306 = arith.addf %304, %305 : vector<2x128xf32>
    %307 = arith.negf %301 : vector<2x128xf32>
    %308 = math.exp %307 : vector<2x128xf32>
    %cst_65 = arith.constant 1.000000e+00 : f32
    %309 = vector.broadcast %cst_65 : f32 to vector<2x128xf32>
    %310 = arith.addf %309, %308 : vector<2x128xf32>
    %311 = arith.divf %309, %310 : vector<2x128xf32>
    %312 = math.tanh %301 : vector<2x128xf32>
    %313 = vector.extract_strided_slice %311 {offsets = [0, 0], sizes = [2, 32], strides = [1, 1]} : vector<2x128xf32> to vector<2x32xf32>
    %314 = vector.extract_strided_slice %311 {offsets = [0, 32], sizes = [2, 32], strides = [1, 1]} : vector<2x128xf32> to vector<2x32xf32>
    %315 = vector.extract_strided_slice %312 {offsets = [0, 64], sizes = [2, 32], strides = [1, 1]} : vector<2x128xf32> to vector<2x32xf32>
    %316 = vector.extract_strided_slice %311 {offsets = [0, 96], sizes = [2, 32], strides = [1, 1]} : vector<2x128xf32> to vector<2x32xf32>
    %317 = arith.mulf %314, %276 : vector<2x32xf32>
    %318 = arith.mulf %313, %315 : vector<2x32xf32>
    %319 = arith.addf %317, %318 : vector<2x32xf32>
    %320 = math.tanh %319 : vector<2x32xf32>
    %321 = arith.mulf %316, %320 : vector<2x32xf32>
    %322 = arith.negf %306 : vector<2x128xf32>
    %323 = math.exp %322 : vector<2x128xf32>
    %cst_66 = arith.constant 1.000000e+00 : f32
    %324 = vector.broadcast %cst_66 : f32 to vector<2x128xf32>
    %325 = arith.addf %324, %323 : vector<2x128xf32>
    %326 = arith.divf %324, %325 : vector<2x128xf32>
    %327 = math.tanh %306 : vector<2x128xf32>
    %328 = vector.extract_strided_slice %326 {offsets = [0, 0], sizes = [2, 32], strides = [1, 1]} : vector<2x128xf32> to vector<2x32xf32>
    %329 = vector.extract_strided_slice %326 {offsets = [0, 32], sizes = [2, 32], strides = [1, 1]} : vector<2x128xf32> to vector<2x32xf32>
    %330 = vector.extract_strided_slice %327 {offsets = [0, 64], sizes = [2, 32], strides = [1, 1]} : vector<2x128xf32> to vector<2x32xf32>
    %331 = vector.extract_strided_slice %326 {offsets = [0, 96], sizes = [2, 32], strides = [1, 1]} : vector<2x128xf32> to vector<2x32xf32>
    %332 = arith.mulf %329, %291 : vector<2x32xf32>
    %333 = arith.mulf %328, %330 : vector<2x32xf32>
    %334 = arith.addf %332, %333 : vector<2x32xf32>
    %335 = math.tanh %334 : vector<2x32xf32>
    %336 = arith.mulf %331, %335 : vector<2x32xf32>
    %c0_67 = arith.constant 0 : index
    %c6 = arith.constant 6 : index
    %c0_68 = arith.constant 0 : index
    %337 = vector.load %arg13[%c0_67, %c6, %c0_68] : memref<2x8x32xf32, #tpu.memory_space<vmem>>, vector<2x1x32xf32>
    %338 = vector.shape_cast %337 : vector<2x1x32xf32> to vector<2x32xf32>
    %339 = vector.shape_cast %336 : vector<2x32xf32> to vector<2x1x32xf32>
    tpu.vector_store %arg13[%c0_67, %c6, %c0_68], %339 {strides = array<i32>} : memref<2x8x32xf32, #tpu.memory_space<vmem>>, vector<2x1x32xf32>,
    %340 = tpu.concatenate %321, %336 in 1 : vector<2x32xf32>, vector<2x32xf32> -> vector<2x64xf32>
    %341 = arith.truncf %340 : vector<2x64xf32> to vector<2x64xbf16>
    %cst_69 = arith.constant dense<0.000000e+00> : vector<2x128xf32>
    %342 = tpu.matmul %341, %9, %cst_69 {dimension_numbers = #tpu.dot_dimension_numbers<[1], [0], [0], [1], [0, 0, 1, 1], [], []>} : vector<2x64xbf16>, vector<64x128xbf16>, vector<2x128xf32> -> vector<2x128xf32>
    %343 = vector.broadcast %10 : vector<1x128xf32> to vector<2x128xf32>
    %344 = arith.addf %342, %343 : vector<2x128xf32>
    %345 = arith.negf %344 : vector<2x128xf32>
    %346 = math.exp %345 : vector<2x128xf32>
    %cst_70 = arith.constant 1.000000e+00 : f32
    %347 = vector.broadcast %cst_70 : f32 to vector<2x128xf32>
    %348 = arith.addf %347, %346 : vector<2x128xf32>
    %349 = arith.divf %347, %348 : vector<2x128xf32>
    %350 = math.tanh %344 : vector<2x128xf32>
    %351 = vector.extract_strided_slice %349 {offsets = [0, 0], sizes = [2, 32], strides = [1, 1]} : vector<2x128xf32> to vector<2x32xf32>
    %352 = vector.extract_strided_slice %349 {offsets = [0, 32], sizes = [2, 32], strides = [1, 1]} : vector<2x128xf32> to vector<2x32xf32>
    %353 = vector.extract_strided_slice %350 {offsets = [0, 64], sizes = [2, 32], strides = [1, 1]} : vector<2x128xf32> to vector<2x32xf32>
    %354 = vector.extract_strided_slice %349 {offsets = [0, 96], sizes = [2, 32], strides = [1, 1]} : vector<2x128xf32> to vector<2x32xf32>
    %355 = arith.mulf %352, %334 : vector<2x32xf32>
    %356 = arith.mulf %351, %353 : vector<2x32xf32>
    %357 = arith.addf %355, %356 : vector<2x32xf32>
    %358 = math.tanh %357 : vector<2x32xf32>
    %359 = arith.mulf %354, %358 : vector<2x32xf32>
    %c0_71 = arith.constant 0 : index
    %c7 = arith.constant 7 : index
    %c0_72 = arith.constant 0 : index
    %360 = vector.load %arg13[%c0_71, %c7, %c0_72] : memref<2x8x32xf32, #tpu.memory_space<vmem>>, vector<2x1x32xf32>
    %361 = vector.shape_cast %360 : vector<2x1x32xf32> to vector<2x32xf32>
    %362 = vector.shape_cast %359 : vector<2x32xf32> to vector<2x1x32xf32>
    tpu.vector_store %arg13[%c0_71, %c7, %c0_72], %362 {strides = array<i32>} : memref<2x8x32xf32, #tpu.memory_space<vmem>>, vector<2x1x32xf32>,
    %c0_73 = arith.constant 0 : index
    %c0_74 = arith.constant 0 : index
    %c0_75 = arith.constant 0 : index
    %363 = vector.load %arg11[%c0_73, %c0_74, %c0_75] : memref<2x2x32xf32, #tpu.memory_space<vmem>>, vector<1x2x32xf32>
    %364 = vector.shape_cast %363 : vector<1x2x32xf32> to vector<2x32xf32>
    %365 = vector.shape_cast %321 : vector<2x32xf32> to vector<1x2x32xf32>
    tpu.vector_store %arg11[%c0_73, %c0_74, %c0_75], %365 {strides = array<i32>} : memref<2x2x32xf32, #tpu.memory_space<vmem>>, vector<1x2x32xf32>,
    %c0_76 = arith.constant 0 : index
    %c0_77 = arith.constant 0 : index
    %c0_78 = arith.constant 0 : index
    %366 = vector.load %arg12[%c0_76, %c0_77, %c0_78] : memref<2x2x32xf32, #tpu.memory_space<vmem>>, vector<1x2x32xf32>
    %367 = vector.shape_cast %366 : vector<1x2x32xf32> to vector<2x32xf32>
    %368 = vector.shape_cast %319 : vector<2x32xf32> to vector<1x2x32xf32>
    tpu.vector_store %arg12[%c0_76, %c0_77, %c0_78], %368 {strides = array<i32>} : memref<2x2x32xf32, #tpu.memory_space<vmem>>, vector<1x2x32xf32>,
    %c1_79 = arith.constant 1 : index
    %c0_80 = arith.constant 0 : index
    %c0_81 = arith.constant 0 : index
    %369 = vector.load %arg11[%c1_79, %c0_80, %c0_81] : memref<2x2x32xf32, #tpu.memory_space<vmem>>, vector<1x2x32xf32>
    %370 = vector.shape_cast %369 : vector<1x2x32xf32> to vector<2x32xf32>
    %371 = vector.shape_cast %359 : vector<2x32xf32> to vector<1x2x32xf32>
    tpu.vector_store %arg11[%c1_79, %c0_80, %c0_81], %371 {strides = array<i32>} : memref<2x2x32xf32, #tpu.memory_space<vmem>>, vector<1x2x32xf32>,
    %c1_82 = arith.constant 1 : index
    %c0_83 = arith.constant 0 : index
    %c0_84 = arith.constant 0 : index
    %372 = vector.load %arg12[%c1_82, %c0_83, %c0_84] : memref<2x2x32xf32, #tpu.memory_space<vmem>>, vector<1x2x32xf32>
    %373 = vector.shape_cast %372 : vector<1x2x32xf32> to vector<2x32xf32>
    %374 = vector.shape_cast %357 : vector<2x32xf32> to vector<1x2x32xf32>
    tpu.vector_store %arg12[%c1_82, %c0_83, %c0_84], %374 {strides = array<i32>} : memref<2x2x32xf32, #tpu.memory_space<vmem>>, vector<1x2x32xf32>,
    %c0_85 = arith.constant 0 : index
    %c0_86 = arith.constant 0 : index
    %c0_87 = arith.constant 0 : index
    %375 = vector.load %arg13[%c0_85, %c0_86, %c0_87] : memref<2x8x32xf32, #tpu.memory_space<vmem>>, vector<2x8x32xf32>
    %376 = vector.shape_cast %375 : vector<2x8x32xf32> to vector<16x32xf32>
    %377 = arith.truncf %376 : vector<16x32xf32> to vector<16x32xbf16>
    %c0_88 = arith.constant 0 : index
    %c0_89 = arith.constant 0 : index
    %378 = vector.load %arg6[%c0_88, %c0_89] : memref<32x128xbf16, #tpu.memory_space<vmem>>, vector<32x128xbf16>
    %cst_90 = arith.constant dense<0.000000e+00> : vector<16x128xf32>
    %379 = tpu.matmul %377, %378, %cst_90 {dimension_numbers = #tpu.dot_dimension_numbers<[1], [0], [0], [1], [0, 0, 1, 1], [], []>} : vector<16x32xbf16>, vector<32x128xbf16>, vector<16x128xf32> -> vector<16x128xf32>
    %c0_91 = arith.constant 0 : index
    %c0_92 = arith.constant 0 : index
    %380 = vector.load %arg7[%c0_91, %c0_92] : memref<1x128xf32, #tpu.memory_space<vmem>>, vector<1x128xf32>
    %381 = vector.broadcast %380 : vector<1x128xf32> to vector<16x128xf32>
    %382 = arith.addf %379, %381 : vector<16x128xf32>
    %c0_93 = arith.constant 0 : index
    %c0_94 = arith.constant 0 : index
    %383 = vector.load %arg10[%c0_93, %c0_94] : memref<16x128xf32, #tpu.memory_space<vmem>>, vector<16x128xf32>
    tpu.vector_store %arg10[%c0_93, %c0_94], %382 {strides = array<i32>} : memref<16x128xf32, #tpu.memory_space<vmem>>, vector<16x128xf32>,
    return
  }
}

</mosaic_0001>

<bundles_post_ra>
// kernel: char_rnn_forward.1
= control target key start
LH: loop header
LB: loop body
LE: loop exit
PB: predicated region body
PF: predicated region fallthrough
CT: control target
= control target key end

     0   :  { %18 = vsyncpa [#allocation4], 0  ;;  %v2825_v1 = vmov 0.0   ;;  %vm2826_vm0 = vmmov 0   ;;  %vm63_vm1 = vcmask 130048   ;;  %vm140_vm2 = vcmask 261120   ;;  %s3514_s0 = inlined_call_operand.vmem [shape: bf16[2,8,16], index: 0, kind: input, shape index: {}]   ;;  %s3515_s1 = inlined_call_operand.vmem [shape: bf16[16,128], index: 1, kind: input, shape index: {}]   ;;  %s3516_s2 = inlined_call_operand.vmem [shape: bf16[32,128], index: 2, kind: input, shape index: {}]   ;;  %s3517_s3 = inlined_call_operand.vmem [shape: f32[1,128], index: 3, kind: input, shape index: {}]   ;;  %s3518_s4 = inlined_call_operand.vmem [shape: bf16[64,128], index: 4, kind: input, shape index: {}]   ;;  %s3519_s5 = inlined_call_operand.vmem [shape: f32[1,128], index: 5, kind: input, shape index: {}]   ;;  %s3520_s6 = inlined_call_operand.vmem [shape: bf16[32,128], index: 6, kind: input, shape index: {}]   ;;  %s3521_s7 = inlined_call_operand.vmem [shape: f32[1,128], index: 7, kind: input, shape index: {}]   ;;  %s3522_s8 = inlined_call_operand.vmem [shape: f32[2,2,32], index: 8, kind: input, shape index: {}]   ;;  %s3523_s9 = inlined_call_operand.vmem [shape: f32[2,2,32], index: 9, kind: input, shape index: {}]   ;;  %s3524_s10 = inlined_call_operand.hbm [shape: f32[16,128], index: 10, kind: output, shape index: {0}]   ;;  %s3525_s11 = inlined_call_operand.hbm [shape: f32[2,2,32], index: 11, kind: output, shape index: {1}]   ;;  %s3526_s12 = inlined_call_operand.hbm [shape: f32[2,2,32], index: 12, kind: output, shape index: {2}]  }
   0x1   :  { %v2552_v0 = vld [vmem:[%s3515_s1] sm:$0xff]   ;;  %2361 = vmatprep.subr.bf16.mxu0 %v2825_v1  ;;  %2367 = vmatprep.subr.bf16.mxu1 %v2825_v1  ;;  %v2910_v2 = vld [vmem:[%s3516_s2 + $0x8] sm:$0xff]  }
   0x2   :  { %2362 = vmatpush3.bf16.msra.mxu0 %v2552_v0  ;;  %2363 = vmatprep.mubr.msk.bf16.mxu0 %vm2826_vm0, %v2825_v1  ;;  %v2554_v3 = vld [vmem:[%s3514_s0] sm:$0xff]   ;;  %s2827_s0 = smov 32  }
   0x3   :  { %2368 = vmatpush3.bf16.msra.mxu1 %v2910_v2  ;;  %v2921_v4 = vld [vmem:[%s3516_s2] sm:$0xff]   ;;  %2371 = vmatprep.mubr.msk.bf16.mxu1 %vm2826_vm0, %v2825_v1 }
   0x4   :  { %2369 = vmatprep.subr.bf16.mxu1 %v2825_v1  ;;  %v121_v5 = vld [vmem:[%s3522_s8] sm:$0x3]  ;;  %2375 = vmatprep.subr.bf16.mxu0 %v2825_v1 }
   0x5   :  { %v124_v6 = vld [vmem:[%s3523_s9] sm:$0x3]  ;;  %2364 = vmatmul.mubr.msk.bf16.vlgmr.msra.gmra.mxu0 %vm63_vm1, %v2554_v3  ;;  %v127_v8 = vpack.c.bf16 %v121_v5, %v121_v5 }
   0x6   :  { %v205_v7 = vrot.slane %v124_v6, 1  ;;  %2376 = vmatpush3.bf16.msra.mxu0 %v2910_v2  ;;  %2379 = vmatprep.mubr.msk.bf16.mxu0 %vm2826_vm0, %v2825_v1 }
   0x7   :  { %2370 = vmatpush3.bf16.msra.mxu1 %v2921_v4  ;;  %2377 = vmatprep.subr.bf16.mxu0 %v2825_v1 }
   0x8   :  { %208 = vrot.lane.b32.xlu1 %v205_v7, %s2827_s0  ;;  %2383 = vmatprep.subr.bf16.mxu1 %v2825_v1 }
   0x9   :  { %19 = vsyncpa [#allocation6], 0  ;;  %v2235_v11 = vld [vmem:[%s3517_s3] ss:$0 sm:$0xff]  ;;  %s2828_s16 = smov 64   ;;  %v2969_v46 = vld [vmem:[%s3518_s4 + $0x18] sm:$0xff]  }
   0xa   :  { %2372 = vmatmul.mubr.msk.bf16.vlgmr.msra.gmra.mxu1 %vm140_vm2, %v127_v8  ;;  %2378 = vmatpush3.bf16.msra.mxu0 %v2921_v4  ;;  %v2975_v47 = vld [vmem:[%s3518_s4 + $0x10] sm:$0xff]   ;;  %v2983_v49 = vld [vmem:[%s3518_s4 + $0x8] sm:$0xff]   ;;  %v2991_v50 = vld [vmem:[%s3518_s4] sm:$0xff]   ;;  %vm253_vm3 = vcmask 1041409   ;;  %vm350_vm4 = vcmask 523264   ;;  %vm580_vm5 = vcmask 1042434  }
   0xb   :  { %2391 = vmatprep.mubr.msk.bf16.mxu1 %vm2826_vm0, %v2825_v1  ;;  %2395 = vmatprep.subr.bf16.mxu0 %v2825_v1  ;;  %v2239_v58 = vld [vmem:[%s3522_s8 + $0x2] sm:$0x3]  ;;  %vm823_vm6 = vcmask 1043459   ;;  %vm1061_vm7 = vcmask 1044484   ;;  %vm1305_vm8 = vcmask 1045509   ;;  %vm1543_vm9 = vcmask 1046534  }
   0xc   :  { %206 = vrot.lane.b32.xlu1 %v124_v6, %s2827_s0  ;;  %2384 = vmatpush3.bf16.msra.mxu1 %v2969_v46  ;;  %vm1787_vm10 = vcmask 1047559   ;;  %vm513_vm11 = vcmask 253952   ;;  %vm2090_vm12 = vcmask 261127   ;;  %vm2108_vm13 = vcmask 254976   ;;  %s2831_s23 = smov [#allocation5]  }
   0xd   :  { %2385 = vmatprep.subr.bf16.mxu1 %v2825_v1  ;;  %s2205_s24 = sshll.u32 %s2831_s23, 4  ;;  %s2206_s24 = int_to_ptr.vmem [resolvable:$true] %s2205_s24 }
   0xe   :  { %s2761_s25 = scalar_lea.vmem %s2206_s24, 64  ;;  %p2766_p1 = scmp.lt.s32.totalorder %s2206_s24, %s2206_s24 }
   0xf   :  { %p2762_p0 = scmp.ne.s32.totalorder %s2206_s24, %s2761_s25  ;;  %p2767_p2 = scmp.lt.s32.totalorder %s2761_s25, %s2761_s25 }
  0x10   :  { %2386 = vmatpush3.bf16.msra.mxu1 %v2975_v47 }
  0x11   :  { %2387 = vmatprep.subr.bf16.mxu1 %v2825_v1  ;;  %p2768_p3 = por %p2767_p2, %p2766_p1 }
  0x13   :  { %p2769_p4 = pnand %p2768_p3, %p2762_p0 }
  0x14   :  { %2388 = vmatpush3.bf16.msra.mxu1 %v2983_v49 }
  0x15   :  { %2389 = vmatprep.subr.bf16.mxu1 %v2825_v1 }
  0x18   :  { %2390 = vmatpush3.bf16.msra.mxu1 %v2991_v50 }
  0x19   :  { %2415 = vmatprep.subr.bf16.mxu1 %v2825_v1 }
  0x7a   :  { %v209_v37 = vpop.permute.xlu1 %208 }
  0x7e   :  { %v207_v39 = vpop.permute.xlu1 %206 }
  0xc5   :  { %v101_v9 = vpop.f32.mrf.mxu0 }
  0xc6   :  { %v2952_v19 = vadd.f32 %v2235_v11, %v101_v9 }
  0xc7   :  { %v2365_v10 = vpop.f32.mrf.mxu0 }
  0xc9   :  { %v104_v12 = vpop.f32.mrf.mxu0 }
  0xca   :  { %v2949_v13 = vadd.f32 %v2235_v11, %v104_v12  ;;  %v178_v14 = vpop.f32.mrf.mxu1 }
  0xcb   :  { %v185_v15 = vrot.slane %v178_v14, 1  ;;  %v2366_v16 = vpop.f32.mrf.mxu0  ;;  %v188_v21 = vadd.f32 %v178_v14, %v2952_v19 }
  0xcc   :  { %v2373_v17 = vpop.f32.mrf.mxu1 }
  0xcd   :  { %v189_v18 = vadd.f32 %v185_v15, %v2949_v13  ;;  %v2244_v26 = vmul.f32 -1.442695, %v188_v21 }
  0xce   :  { %v181_v20 = vpop.f32.mrf.mxu1 }
  0xcf   :  { %2562 = vtanh.f32 %v189_v18  ;;  %v2245_v25 = vmul.f32 -1.442695, %v189_v18  ;;  %v3022_v18 = vld [vmem:[%s3519_s5] ss:$0 sm:$0xff] }
  0xd0   :  { %v2374_v22 = vpop.f32.mrf.mxu1  ;;  %2564 = vtanh.f32 %v188_v21 }
  0xd1   :  { %2566 = vpow2.f32 %v2245_v25 }
  0xd2   :  { %2568 = vpow2.f32 %v2244_v26 }
  0xdc   :  { %v2563_v23 = vpop.eup %2562 }
  0xdd   :  { %218 = vrot.lane.b32.xlu0 %v2563_v23, %s2828_s16  ;;  %v2565_v24 = vpop.eup %2564 }
  0xde   :  { %v2567_v27 = vpop.eup %2566 }
  0xdf   :  { %v197_v28 = vadd.f32 1.0, %v2567_v27  ;;  %v2569_v29 = vpop.eup %2568 }
  0xe0   :  { %v196_v30 = vadd.f32 1.0, %v2569_v29 }
  0xe1   :  { %216 = vrot.lane.b32.xlu0 %v2565_v24, %s2828_s16  ;;  %2570 = vrcp.f32 %v197_v28 }
  0xe2   :  { %2572 = vrcp.f32 %v196_v30 }
  0xee   :  { %v2571_v31 = vpop.eup %2570 }
  0xef   :  { %v2573_v34 = vpop.eup %2572  ;;  %v213_v38 = vmul.f32 %v2571_v31, %v209_v37 }
  0xf0   :  { %v212_v42 = vmul.f32 %v2573_v34, %v207_v39 }
 0x14f   :  { %v219_v32 = vpop.permute.xlu0 %218 }
 0x150   :  { %v223_v33 = vmul.f32 %v2571_v31, %v219_v32 }
 0x152   :  { %228 = vrot.lane.b32.xlu0 %v223_v33, %s2827_s0 }
 0x153   :  { %v217_v35 = vpop.permute.xlu0 %216 }
 0x154   :  { %v222_v36 = vmul.f32 %v2573_v34, %v217_v35 }
 0x156   :  { %226 = vrot.lane.b32.xlu1 %v222_v36, %s2827_s0 }
 0x1c4   :  { %v229_v40 = vpop.permute.xlu0 %228 }
 0x1c5   :  { %v2959_v41 = vadd.f32 %v229_v40, %v213_v38 }
 0x1c7   :  { %2574 = vtanh.f32 %v2959_v41 }
 0x1c8   :  { %v227_v43 = vpop.permute.xlu1 %226 }
 0x1c9   :  { %v2962_v44 = vadd.f32 %v227_v43, %v212_v42 }
 0x1cb   :  { %2576 = vtanh.f32 %v2962_v44 }
 0x1d4   :  { %v2575_v45 = vpop.eup %2574 }
 0x1d5   :  { %240 = vrot.lane.b32.xlu0 %v2575_v45, %s2828_s16 }
 0x1d8   :  { %v2577_v48 = vpop.eup %2576 }
 0x1d9   :  { %238 = vrot.lane.b32.xlu1 %v2577_v48, %s2828_s16 }
 0x247   :  { %v241_v51 = vpop.permute.xlu0 %240 }
 0x248   :  { %v245_v52 = vmul.f32 %v2571_v31, %v241_v51 }
 0x24a   :  { %v247_v53 = vpack.c.bf16 %v245_v52, %v245_v52  ;;  %v309_v56 = vrot.slane %v245_v52, 7  ;;  %v2240_v52 = vld [vmem:[%s3523_s9 + $0x2] sm:$0x3] }
 0x24b   :  { %v239_v54 = vpop.permute.xlu1 %238 }
 0x24c   :  { %v251_v55 = vunpack.c.l.b16 %v247_v53  ;;  %v244_v57 = vmul.f32 %v2573_v34, %v239_v54  ;;  %v411_v54 = vrot.slane %v2959_v41, 7 }
 0x24e   :  { %v246_v59 = vpack.c.bf16 %v244_v57, %v244_v57  ;;  %v310_v60 = vsel %vm253_vm3, %v309_v56, %v244_v57  ;;  %v252_v62 = vrot.slane %v251_v55, 7  ;;  %v410_v56 = vrot.slane %v2962_v44, 7 }
 0x24f   :  { %v2547_v61 = vpack.i.bf16 %v2239_v58, %v310_v60 }
 0x250   :  { %v250_v63 = vunpack.c.l.b16 %v246_v59 }
 0x251   :  { %2548 = vrot.lane.b32.xlu1 %v2547_v61, %s2827_s0 }
 0x252   :  { %v254_v0 = vsel %vm253_vm3, %v252_v62, %v250_v63 }
 0x253   :  { %v255_v3 = vpack.c.b16 %v254_v0, %v254_v0 }
 0x255   :  { %256 = vrot.lane.b32.xlu0 %v255_v3, %s2827_s0 }
 0x2c3   :  { %v2549_v5 = vpop.permute.xlu1 %2548 }
 0x2c4   :  { %v2551_v6 = vunpack.i.h.bf16 %v2549_v5  ;;  %v2550_v7 = vunpack.i.l.bf16 %v2549_v5 }
 0x2c6   :  { %v318_v8 = vsel %vm140_vm2, %v2550_v7, %v2551_v6 }
 0x2c7   :  { %v319_v9 = vpack.c.bf16 %v318_v8, %v318_v8  ;;  %v257_v10 = vpop.permute.xlu0 %256 }
 0x2c8   :  { %2380 = vmatmul.mubr.msk.bf16.vlgmr.msra.gmra.mxu0 %vm140_vm2, %v257_v10 }
 0x2c9   :  { %2392 = vmatmul.mubr.msk.bf16.vlgmr.msra.gmra.mxu1 %vm350_vm4, %v319_v9  ;;  %2396 = vmatpush3.bf16.msra.mxu0 %v2910_v2 }
 0x2ca   :  { %2397 = vmatprep.subr.bf16.mxu0 %v2825_v1  ;;  %2399 = vmatprep.mubr.msk.bf16.mxu0 %vm2826_vm0, %v2825_v1 }
 0x2cb   :  { %2416 = vmatpush3.bf16.msra.mxu1 %v2910_v2  ;;  %2419 = vmatprep.mubr.msk.bf16.mxu1 %vm2826_vm0, %v2825_v1 }
 0x2cc   :  { %2417 = vmatprep.subr.bf16.mxu1 %v2825_v1 }
 0x2cd   :  { %2398 = vmatpush3.bf16.msra.mxu0 %v2921_v4 }
 0x2ce   :  { %2403 = vmatprep.subr.bf16.mxu0 %v2825_v1 }
 0x2cf   :  { %2418 = vmatpush3.bf16.msra.mxu1 %v2921_v4 }
 0x2d0   :  { %2423 = vmatprep.subr.bf16.mxu1 %v2825_v1 }
 0x388   :  { %v295_v11 = vpop.f32.mrf.mxu0 }
 0x389   :  { %v302_v12 = vrot.slane %v295_v11, 7  ;;  %v306_v14 = vadd.f32 %v295_v11, %v2949_v13  ;;  %v388_v15 = vpop.f32.mrf.mxu1 }
 0x38a   :  { %v2381_v16 = vpop.f32.mrf.mxu0  ;;  %v389_v23 = vadd.f32 %v3022_v18, %v388_v15 }
 0x38b   :  { %v305_v17 = vadd.f32 %v302_v12, %v2952_v19  ;;  %2578 = vtanh.f32 %v306_v14  ;;  %v2393_v20 = vpop.f32.mrf.mxu1  ;;  %v2254_v29 = vmul.f32 -1.442695, %v306_v14 }
 0x38c   :  { %v298_v21 = vpop.f32.mrf.mxu0  ;;  %v2255_v31 = vmul.f32 -1.442695, %v389_v23 }
 0x38d   :  { %v391_v22 = vpop.f32.mrf.mxu1  ;;  %2580 = vtanh.f32 %v305_v17  ;;  %v2253_v30 = vmul.f32 -1.442695, %v305_v17 }
 0x38e   :  { %v2382_v24 = vpop.f32.mrf.mxu0  ;;  %2582 = vtanh.f32 %v389_v23 }
 0x38f   :  { %v2394_v25 = vpop.f32.mrf.mxu1  ;;  %2584 = vpow2.f32 %v2254_v29 }
 0x390   :  { %2586 = vpow2.f32 %v2253_v30 }
 0x391   :  { %2588 = vpow2.f32 %v2255_v31 }
 0x398   :  { %v2579_v26 = vpop.eup %2578 }
 0x399   :  { %420 = vrot.lane.b32.xlu1 %v2579_v26, %s2828_s16 }
 0x39a   :  { %v2581_v27 = vpop.eup %2580 }
 0x39b   :  { %418 = vrot.lane.b32.xlu0 %v2581_v27, %s2828_s16  ;;  %v2583_v28 = vpop.eup %2582 }
 0x39c   :  { %v2585_v32 = vpop.eup %2584 }
 0x39d   :  { %v2587_v33 = vpop.eup %2586  ;;  %v401_v34 = vadd.f32 1.0, %v2585_v32 }
 0x39e   :  { %v400_v35 = vadd.f32 1.0, %v2587_v33  ;;  %v2589_v36 = vpop.eup %2588 }
 0x39f   :  { %461 = vrot.lane.b32.xlu0 %v2583_v28, %s2828_s16  ;;  %2590 = vrcp.f32 %v401_v34  ;;  %v451_v37 = vadd.f32 1.0, %v2589_v36 }
 0x3a0   :  { %2592 = vrcp.f32 %v400_v35 }
 0x3a1   :  { %2594 = vrcp.f32 %v451_v37 }
 0x3ac   :  { %v2591_v38 = vpop.eup %2590 }
 0x3ad   :  { %v2593_v42 = vpop.eup %2592  ;;  %v415_v55 = vmul.f32 %v2591_v38, %v411_v54 }
 0x3ae   :  { %v2595_v48 = vpop.eup %2594  ;;  %v414_v59 = vmul.f32 %v2593_v42, %v410_v56 }
 0x40b   :  { %v421_v39 = vpop.permute.xlu1 %420 }
 0x40c   :  { %v425_v40 = vmul.f32 %v2591_v38, %v421_v39 }
 0x40d   :  { %v419_v43 = vpop.permute.xlu0 %418 }
 0x40e   :  { %430 = vrot.lane.b32.xlu0 %v425_v40, %s2827_s0  ;;  %v424_v45 = vmul.f32 %v2593_v42, %v419_v43 }
 0x410   :  { %428 = vrot.lane.b32.xlu1 %v424_v45, %s2827_s0 }
 0x411   :  { %v462_v51 = vpop.permute.xlu0 %461 }
 0x412   :  { %v464_v53 = vmul.f32 %v2595_v48, %v462_v51 }
 0x414   :  { %466 = vrot.lane.b32.xlu0 %v464_v53, %s2827_s0  ;;  %456 = vrot.lane.b32.xlu1 %v2240_v52, %s2827_s0 }
 0x480   :  { %v431_v57 = vpop.permute.xlu0 %430 }
 0x481   :  { %v3037_v58 = vadd.f32 %v431_v57, %v415_v55 }
 0x482   :  { %v429_v60 = vpop.permute.xlu1 %428 }
 0x483   :  { %2596 = vtanh.f32 %v3037_v58  ;;  %v3040_v61 = vadd.f32 %v429_v60, %v414_v59 }
 0x485   :  { %2598 = vtanh.f32 %v3040_v61 }
 0x486   :  { %v457_v62 = vpop.permute.xlu1 %456  ;;  %v467_v0 = vpop.permute.xlu0 %466 }
 0x487   :  { %v459_v63 = vmul.f32 %v2595_v48, %v457_v62 }
 0x489   :  { %v3043_v3 = vadd.f32 %v467_v0, %v459_v63 }
 0x48b   :  { %2600 = vtanh.f32 %v3043_v3 }
 0x490   :  { %v2597_v41 = vpop.eup %2596 }
 0x491   :  { %442 = vrot.lane.b32.xlu0 %v2597_v41, %s2828_s16 }
 0x492   :  { %v2599_v44 = vpop.eup %2598 }
 0x493   :  { %440 = vrot.lane.b32.xlu1 %v2599_v44, %s2828_s16 }
 0x498   :  { %v2601_v5 = vpop.eup %2600 }
 0x499   :  { %472 = vrot.lane.b32.xlu1 %v2601_v5, %s2828_s16 }
 0x503   :  { %v443_v6 = vpop.permute.xlu0 %442 }
 0x504   :  { %v447_v7 = vmul.f32 %v2591_v38, %v443_v6 }
 0x505   :  { %v441_v9 = vpop.permute.xlu1 %440 }
 0x506   :  { %v579_v8 = vrot.slane %v447_v7, 7  ;;  %v446_v10 = vmul.f32 %v2593_v42, %v441_v9  ;;  %v517_v11 = vpack.c.bf16 %v447_v7, %v447_v7 }
 0x508   :  { %v516_v12 = vpack.c.bf16 %v446_v10, %v446_v10  ;;  %v581_v14 = vsel %vm580_vm5, %v579_v8, %v446_v10  ;;  %v521_v16 = vunpack.c.l.b16 %v517_v11 }
 0x509   :  { %582 = vrot.lane.b32.xlu1 %v581_v14, %s2827_s0 }
 0x50a   :  { %v520_v15 = vunpack.c.l.b16 %v516_v12 }
 0x50b   :  { %v473_v20 = vpop.permute.xlu1 %472 }
 0x50c   :  { %v522_v17 = vrot.slane %v520_v15, 1  ;;  %v3051_v22 = vmul.f32 %v2595_v48, %v473_v20  ;;  %v657_v15 = vrot.slane %v3040_v61, 7 }
 0x50e   :  { %v523_v21 = vsel %vm253_vm3, %v521_v16, %v522_v17  ;;  %v585_v24 = vrot.slane %v3051_v22, 7  ;;  %v658_v16 = vrot.slane %v3037_v58, 7 }
 0x50f   :  { %v524_v23 = vpack.c.b16 %v523_v21, %v523_v21 }
 0x511   :  { %525 = vrot.lane.b32.xlu0 %v524_v23, %s2827_s0 }
 0x515   :  { %586 = vrot.lane.b32.xlu0 %v585_v24, %s2828_s16 }
 0x57b   :  { %v583_v26 = vpop.permute.xlu1 %582 }
 0x583   :  { %v526_v25 = vpop.permute.xlu0 %525 }
 0x584   :  { %2400 = vmatmul.mubr.msk.bf16.vlgmr.msra.gmra.mxu0 %vm140_vm2, %v526_v25 }
 0x585   :  { %2404 = vmatpush3.bf16.msra.mxu0 %v2969_v46  ;;  %2411 = vmatprep.mubr.msk.bf16.mxu0 %vm2826_vm0, %v2825_v1 }
 0x586   :  { %2405 = vmatprep.subr.bf16.mxu0 %v2825_v1 }
 0x587   :  { %v587_v27 = vpop.permute.xlu0 %586 }
 0x588   :  { %v589_v28 = vsel %vm140_vm2, %v583_v26, %v587_v27 }
 0x589   :  { %v590_v29 = vpack.c.bf16 %v589_v28, %v589_v28  ;;  %2406 = vmatpush3.bf16.msra.mxu0 %v2975_v47 }
 0x58a   :  { %2407 = vmatprep.subr.bf16.mxu0 %v2825_v1 }
 0x58b   :  { %v594_v30 = vshll.u32 %v590_v29, 16  ;;  %v592_v32 = vshrl.u32 %v590_v29, 16 }
 0x58d   :  { %2408 = vmatpush3.bf16.msra.mxu0 %v2983_v49  ;;  %v596_v31 = vrot.slane %v594_v30, 1 }
 0x58e   :  { %2409 = vmatprep.subr.bf16.mxu0 %v2825_v1 }
 0x58f   :  { %v597_v33 = vor.u32 %v596_v31, %v592_v32 }
 0x591   :  { %2410 = vmatpush3.bf16.msra.mxu0 %v2991_v50 }
 0x592   :  { %2435 = vmatprep.subr.bf16.mxu0 %v2825_v1 }
 0x594   :  { %2412 = vmatmul.mubr.msk.bf16.vlgmr.msra.gmra.mxu0 %vm350_vm4, %v597_v33 }
 0x595   :  { %2436 = vmatpush3.bf16.msra.mxu0 %v2910_v2  ;;  %2439 = vmatprep.mubr.msk.bf16.mxu0 %vm2826_vm0, %v2825_v1 }
 0x596   :  { %2437 = vmatprep.subr.bf16.mxu0 %v2825_v1 }
 0x599   :  { %2438 = vmatpush3.bf16.msra.mxu0 %v2921_v4 }
 0x59a   :  { %2443 = vmatprep.subr.bf16.mxu0 %v2825_v1 }
 0x644   :  { %v564_v34 = vpop.f32.mrf.mxu0 }
 0x645   :  { %v571_v35 = vrot.slane %v564_v34, 6  ;;  %v572_v36 = vrot.slane %v564_v34, 7 }
 0x646   :  { %v2401_v37 = vpop.f32.mrf.mxu0 }
 0x647   :  { %v575_v38 = vadd.f32 %v571_v35, %v2952_v19  ;;  %v576_v39 = vadd.f32 %v572_v36, %v2949_v13 }
 0x648   :  { %v567_v40 = vpop.f32.mrf.mxu0 }
 0x649   :  { %2602 = vtanh.f32 %v575_v38  ;;  %v2258_v56 = vmul.f32 -1.442695, %v575_v38  ;;  %v2259_v57 = vmul.f32 -1.442695, %v576_v39 }
 0x64a   :  { %2604 = vtanh.f32 %v576_v39  ;;  %v2402_v42 = vpop.f32.mrf.mxu0 }
 0x654   :  { %v635_v43 = vpop.f32.mrf.mxu0 }
 0x655   :  { %v636_v45 = vadd.f32 %v3022_v18, %v635_v43 }
 0x656   :  { %v2603_v48 = vpop.eup %2602  ;;  %v2413_v51 = vpop.f32.mrf.mxu0 }
 0x657   :  { %v2605_v52 = vpop.eup %2604  ;;  %2606 = vtanh.f32 %v636_v45  ;;  %665 = vrot.lane.b32.xlu1 %v2603_v48, %s2828_s16  ;;  %v2260_v59 = vmul.f32 -1.442695, %v636_v45 }
 0x658   :  { %667 = vrot.lane.b32.xlu0 %v2605_v52, %s2828_s16  ;;  %v638_v53 = vpop.f32.mrf.mxu0  ;;  %2608 = vpow2.f32 %v2258_v56 }
 0x659   :  { %2610 = vpow2.f32 %v2259_v57 }
 0x65a   :  { %v2414_v54 = vpop.f32.mrf.mxu0  ;;  %2612 = vpow2.f32 %v2260_v59 }
 0x664   :  { %v2607_v55 = vpop.eup %2606 }
 0x665   :  { %704 = vrot.lane.b32.xlu1 %v2607_v55, %s2828_s16  ;;  %v2609_v60 = vpop.eup %2608 }
 0x666   :  { %v2611_v62 = vpop.eup %2610  ;;  %v647_v63 = vadd.f32 1.0, %v2609_v60 }
 0x667   :  { %v648_v0 = vadd.f32 1.0, %v2611_v62  ;;  %v2613_v41 = vpop.eup %2612 }
 0x668   :  { %2614 = vrcp.f32 %v647_v63  ;;  %v698_v44 = vadd.f32 1.0, %v2613_v41 }
 0x669   :  { %2616 = vrcp.f32 %v648_v0 }
 0x66a   :  { %2618 = vrcp.f32 %v698_v44 }
 0x675   :  { %v2615_v5 = vpop.eup %2614 }
 0x676   :  { %v2617_v7 = vpop.eup %2616  ;;  %v661_v17 = vmul.f32 %v2615_v5, %v657_v15 }
 0x677   :  { %v2619_v11 = vpop.eup %2618  ;;  %v662_v21 = vmul.f32 %v2617_v7, %v658_v16 }
 0x678   :  { %v702_v26 = vmul.f32 %v2619_v11, %v3043_v3 }
 0x6c9   :  { %v666_v6 = vpop.permute.xlu1 %665 }
 0x6ca   :  { %v668_v8 = vpop.permute.xlu0 %667  ;;  %v671_v9 = vmul.f32 %v2615_v5, %v666_v6 }
 0x6cb   :  { %v672_v10 = vmul.f32 %v2617_v7, %v668_v8 }
 0x6cc   :  { %675 = vrot.lane.b32.xlu0 %v671_v9, %s2827_s0 }
 0x6cd   :  { %677 = vrot.lane.b32.xlu1 %v672_v10, %s2827_s0 }
 0x6d7   :  { %v705_v12 = vpop.permute.xlu1 %704 }
 0x6d8   :  { %v707_v14 = vmul.f32 %v2619_v11, %v705_v12 }
 0x6da   :  { %709 = vrot.lane.b32.xlu0 %v707_v14, %s2827_s0 }
 0x73e   :  { %v676_v20 = vpop.permute.xlu0 %675 }
 0x73f   :  { %v3086_v23 = vadd.f32 %v676_v20, %v661_v17  ;;  %v678_v24 = vpop.permute.xlu1 %677 }
 0x740   :  { %v3088_v25 = vadd.f32 %v678_v24, %v662_v21 }
 0x741   :  { %2620 = vtanh.f32 %v3086_v23 }
 0x742   :  { %2622 = vtanh.f32 %v3088_v25 }
 0x74c   :  { %v710_v27 = vpop.permute.xlu0 %709 }
 0x74d   :  { %v3093_v28 = vadd.f32 %v710_v27, %v702_v26 }
 0x74e   :  { %v2621_v61 = vpop.eup %2620 }
 0x74f   :  { %v2623_v29 = vpop.eup %2622  ;;  %2624 = vtanh.f32 %v3093_v28  ;;  %687 = vrot.lane.b32.xlu1 %v2621_v61, %s2828_s16 }
 0x750   :  { %689 = vrot.lane.b32.xlu0 %v2623_v29, %s2828_s16 }
 0x75c   :  { %v2625_v58 = vpop.eup %2624 }
 0x75d   :  { %715 = vrot.lane.b32.xlu1 %v2625_v58, %s2828_s16 }
 0x7c1   :  { %v688_v30 = vpop.permute.xlu1 %687 }
 0x7c2   :  { %v693_v31 = vmul.f32 %v2615_v5, %v688_v30  ;;  %v690_v32 = vpop.permute.xlu0 %689 }
 0x7c3   :  { %v694_v33 = vmul.f32 %v2617_v7, %v690_v32 }
 0x7c4   :  { %v758_v34 = vpack.c.bf16 %v693_v31, %v693_v31 }
 0x7c5   :  { %v759_v3 = vpack.c.bf16 %v694_v33, %v694_v33  ;;  %v822_v35 = vrot.slane %v694_v33, 7 }
 0x7c6   :  { %v762_v36 = vunpack.c.l.b16 %v758_v34 }
 0x7c7   :  { %v763_v37 = vunpack.c.l.b16 %v759_v3  ;;  %v824_v38 = vsel %vm823_vm6, %v822_v35, %v693_v31 }
 0x7c8   :  { %v764_v39 = vrot.slane %v762_v36, 2  ;;  %825 = vrot.lane.b32.xlu1 %v824_v38, %s2827_s0  ;;  %v895_v36 = vrot.slane %v3086_v23, 7 }
 0x7c9   :  { %v765_v40 = vrot.slane %v763_v37, 1  ;;  %v896_v37 = vrot.slane %v3088_v25, 7 }
 0x7cb   :  { %v766_v42 = vsel %vm253_vm3, %v765_v40, %v764_v39 }
 0x7cc   :  { %v767_v43 = vpack.c.b16 %v766_v42, %v766_v42 }
 0x7ce   :  { %768 = vrot.lane.b32.xlu0 %v767_v43, %s2827_s0 }
 0x7cf   :  { %v716_v45 = vpop.permute.xlu1 %715 }
 0x7d0   :  { %v3102_v48 = vmul.f32 %v2619_v11, %v716_v45 }
 0x7d2   :  { %v828_v51 = vrot.slane %v3102_v48, 6 }
 0x7d4   :  { %829 = vrot.lane.b32.xlu0 %v828_v51, %s2828_s16 }
 0x83a   :  { %v826_v54 = vpop.permute.xlu1 %825 }
 0x840   :  { %v769_v52 = vpop.permute.xlu0 %768 }
 0x841   :  { %2420 = vmatmul.mubr.msk.bf16.vlgmr.msra.gmra.mxu1 %vm140_vm2, %v769_v52 }
 0x842   :  { %2424 = vmatpush3.bf16.msra.mxu1 %v2969_v46  ;;  %2431 = vmatprep.mubr.msk.bf16.mxu1 %vm2826_vm0, %v2825_v1 }
 0x843   :  { %2425 = vmatprep.subr.bf16.mxu1 %v2825_v1 }
 0x846   :  { %2426 = vmatpush3.bf16.msra.mxu1 %v2975_v47  ;;  %v830_v53 = vpop.permute.xlu0 %829 }
 0x847   :  { %2427 = vmatprep.subr.bf16.mxu1 %v2825_v1  ;;  %v832_v55 = vsel %vm140_vm2, %v826_v54, %v830_v53 }
 0x848   :  { %v833_v56 = vpack.c.bf16 %v832_v55, %v832_v55 }
 0x84a   :  { %2428 = vmatpush3.bf16.msra.mxu1 %v2983_v49  ;;  %v835_v57 = vrot.slane %v833_v56, 1 }
 0x84b   :  { %2429 = vmatprep.subr.bf16.mxu1 %v2825_v1 }
 0x84e   :  { %2430 = vmatpush3.bf16.msra.mxu1 %v2991_v50 }
 0x84f   :  { %2455 = vmatprep.subr.bf16.mxu1 %v2825_v1 }
 0x851   :  { %2432 = vmatmul.mubr.msk.bf16.vlgmr.msra.gmra.mxu1 %vm350_vm4, %v835_v57 }
 0x852   :  { %2456 = vmatpush3.bf16.msra.mxu1 %v2910_v2  ;;  %2459 = vmatprep.mubr.msk.bf16.mxu1 %vm2826_vm0, %v2825_v1 }
 0x853   :  { %2457 = vmatprep.subr.bf16.mxu1 %v2825_v1 }
 0x856   :  { %2458 = vmatpush3.bf16.msra.mxu1 %v2921_v4 }
 0x857   :  { %2463 = vmatprep.subr.bf16.mxu1 %v2825_v1 }
 0x901   :  { %v807_v59 = vpop.f32.mrf.mxu1 }
 0x902   :  { %v814_v60 = vrot.slane %v807_v59, 5  ;;  %v815_v62 = vrot.slane %v807_v59, 6 }
 0x903   :  { %v2421_v63 = vpop.f32.mrf.mxu1 }
 0x904   :  { %v818_v0 = vadd.f32 %v814_v60, %v2952_v19  ;;  %v819_v41 = vadd.f32 %v815_v62, %v2949_v13 }
 0x905   :  { %v810_v44 = vpop.f32.mrf.mxu1 }
 0x906   :  { %2626 = vtanh.f32 %v818_v0  ;;  %v2263_v15 = vmul.f32 -1.442695, %v818_v0  ;;  %v2264_v16 = vmul.f32 -1.442695, %v819_v41 }
 0x907   :  { %2628 = vtanh.f32 %v819_v41  ;;  %v2422_v5 = vpop.f32.mrf.mxu1 }
 0x911   :  { %v873_v6 = vpop.f32.mrf.mxu1 }
 0x912   :  { %v874_v7 = vadd.f32 %v3022_v18, %v873_v6 }
 0x913   :  { %v2627_v8 = vpop.eup %2626  ;;  %v2433_v9 = vpop.f32.mrf.mxu1 }
 0x914   :  { %v2629_v10 = vpop.eup %2628  ;;  %2630 = vtanh.f32 %v874_v7  ;;  %903 = vrot.lane.b32.xlu1 %v2627_v8, %s2828_s16  ;;  %v2265_v17 = vmul.f32 -1.442695, %v874_v7 }
 0x915   :  { %905 = vrot.lane.b32.xlu0 %v2629_v10, %s2828_s16  ;;  %v876_v11 = vpop.f32.mrf.mxu1  ;;  %2632 = vpow2.f32 %v2263_v15 }
 0x916   :  { %2634 = vpow2.f32 %v2264_v16 }
 0x917   :  { %v2434_v12 = vpop.f32.mrf.mxu1  ;;  %2636 = vpow2.f32 %v2265_v17 }
 0x921   :  { %v2631_v14 = vpop.eup %2630 }
 0x922   :  { %942 = vrot.lane.b32.xlu1 %v2631_v14, %s2828_s16  ;;  %v2633_v20 = vpop.eup %2632 }
 0x923   :  { %v2635_v21 = vpop.eup %2634  ;;  %v885_v24 = vadd.f32 1.0, %v2633_v20 }
 0x924   :  { %v886_v26 = vadd.f32 1.0, %v2635_v21  ;;  %v2637_v27 = vpop.eup %2636 }
 0x925   :  { %2638 = vrcp.f32 %v885_v24  ;;  %v936_v61 = vadd.f32 1.0, %v2637_v27 }
 0x926   :  { %2640 = vrcp.f32 %v886_v26 }
 0x927   :  { %2642 = vrcp.f32 %v936_v61 }
 0x932   :  { %v2639_v29 = vpop.eup %2638 }
 0x933   :  { %v2641_v30 = vpop.eup %2640  ;;  %v899_v38 = vmul.f32 %v2639_v29, %v895_v36 }
 0x934   :  { %v2643_v34 = vpop.eup %2642  ;;  %v900_v40 = vmul.f32 %v2641_v30, %v896_v37 }
 0x935   :  { %v940_v51 = vmul.f32 %v2643_v34, %v3093_v28 }
 0x986   :  { %v904_v58 = vpop.permute.xlu1 %903 }
 0x987   :  { %v906_v31 = vpop.permute.xlu0 %905  ;;  %v909_v32 = vmul.f32 %v2639_v29, %v904_v58 }
 0x988   :  { %v910_v33 = vmul.f32 %v2641_v30, %v906_v31 }
 0x989   :  { %913 = vrot.lane.b32.xlu0 %v909_v32, %s2827_s0 }
 0x98a   :  { %915 = vrot.lane.b32.xlu1 %v910_v33, %s2827_s0 }
 0x994   :  { %v943_v3 = vpop.permute.xlu1 %942 }
 0x995   :  { %v945_v35 = vmul.f32 %v2643_v34, %v943_v3 }
 0x997   :  { %947 = vrot.lane.b32.xlu0 %v945_v35, %s2827_s0 }
 0x9fb   :  { %v914_v39 = vpop.permute.xlu0 %913 }
 0x9fc   :  { %v3136_v42 = vadd.f32 %v914_v39, %v899_v38  ;;  %v916_v43 = vpop.permute.xlu1 %915 }
 0x9fd   :  { %v3138_v45 = vadd.f32 %v916_v43, %v900_v40 }
 0x9fe   :  { %2644 = vtanh.f32 %v3136_v42 }
 0x9ff   :  { %2646 = vtanh.f32 %v3138_v45 }
 0xa09   :  { %v948_v52 = vpop.permute.xlu0 %947 }
 0xa0a   :  { %v3143_v53 = vadd.f32 %v948_v52, %v940_v51 }
 0xa0b   :  { %v2645_v23 = vpop.eup %2644 }
 0xa0c   :  { %v2647_v54 = vpop.eup %2646  ;;  %2648 = vtanh.f32 %v3143_v53  ;;  %925 = vrot.lane.b32.xlu1 %v2645_v23, %s2828_s16 }
 0xa0d   :  { %927 = vrot.lane.b32.xlu0 %v2647_v54, %s2828_s16 }
 0xa19   :  { %v2649_v25 = vpop.eup %2648 }
 0xa1a   :  { %953 = vrot.lane.b32.xlu1 %v2649_v25, %s2828_s16 }
 0xa7e   :  { %v926_v55 = vpop.permute.xlu1 %925 }
 0xa7f   :  { %v928_v56 = vpop.permute.xlu0 %927  ;;  %v931_v57 = vmul.f32 %v2639_v29, %v926_v55 }
 0xa80   :  { %v932_v59 = vmul.f32 %v2641_v30, %v928_v56 }
 0xa81   :  { %v996_v60 = vpack.c.bf16 %v931_v57, %v931_v57 }
 0xa82   :  { %v997_v28 = vpack.c.bf16 %v932_v59, %v932_v59  ;;  %v1060_v62 = vrot.slane %v932_v59, 7 }
 0xa83   :  { %v1000_v63 = vunpack.c.l.b16 %v996_v60 }
 0xa84   :  { %v1001_v0 = vunpack.c.l.b16 %v997_v28  ;;  %v1062_v41 = vsel %vm1061_vm7, %v1060_v62, %v931_v57 }
 0xa85   :  { %v1002_v44 = vrot.slane %v1000_v63, 3  ;;  %1063 = vrot.lane.b32.xlu1 %v1062_v41, %s2827_s0 }
 0xa86   :  { %v1003_v5 = vrot.slane %v1001_v0, 2 }
 0xa88   :  { %v1004_v6 = vsel %vm253_vm3, %v1003_v5, %v1002_v44  ;;  %v1139_v44 = vrot.slane %v3136_v42, 7  ;;  %v1140_v5 = vrot.slane %v3138_v45, 7 }
 0xa89   :  { %v1005_v7 = vpack.c.b16 %v1004_v6, %v1004_v6 }
 0xa8b   :  { %1006 = vrot.lane.b32.xlu0 %v1005_v7, %s2827_s0 }
 0xa8c   :  { %v954_v8 = vpop.permute.xlu1 %953 }
 0xa8d   :  { %v3152_v9 = vmul.f32 %v2643_v34, %v954_v8 }
 0xa8f   :  { %v1066_v10 = vrot.slane %v3152_v9, 5 }
 0xa91   :  { %1067 = vrot.lane.b32.xlu0 %v1066_v10, %s2828_s16 }
 0xaf7   :  { %v1064_v12 = vpop.permute.xlu1 %1063 }
 0xafd   :  { %v1007_v11 = vpop.permute.xlu0 %1006 }
 0xafe   :  { %2440 = vmatmul.mubr.msk.bf16.vlgmr.msra.gmra.mxu0 %vm140_vm2, %v1007_v11 }
 0xaff   :  { %2444 = vmatpush3.bf16.msra.mxu0 %v2969_v46  ;;  %2451 = vmatprep.mubr.msk.bf16.mxu0 %vm2826_vm0, %v2825_v1 }
 0xb00   :  { %2445 = vmatprep.subr.bf16.mxu0 %v2825_v1 }
 0xb03   :  { %2446 = vmatpush3.bf16.msra.mxu0 %v2975_v47  ;;  %v1068_v14 = vpop.permute.xlu0 %1067 }
 0xb04   :  { %v1070_v15 = vsel %vm140_vm2, %v1064_v12, %v1068_v14  ;;  %2447 = vmatprep.subr.bf16.mxu0 %v2825_v1 }
 0xb05   :  { %v1071_v16 = vpack.c.bf16 %v1070_v15, %v1070_v15 }
 0xb07   :  { %v1073_v17 = vshrl.u32 %v1071_v16, 16  ;;  %v1076_v20 = vshll.u32 %v1071_v16, 16  ;;  %2448 = vmatpush3.bf16.msra.mxu0 %v2983_v49 }
 0xb08   :  { %2449 = vmatprep.subr.bf16.mxu0 %v2825_v1 }
 0xb09   :  { %v1075_v21 = vrot.slane %v1073_v17, 1  ;;  %v1078_v24 = vrot.slane %v1076_v20, 2 }
 0xb0b   :  { %v1079_v26 = vor.u32 %v1078_v24, %v1075_v21  ;;  %2450 = vmatpush3.bf16.msra.mxu0 %v2991_v50 }
 0xb0c   :  { %2475 = vmatprep.subr.bf16.mxu0 %v2825_v1 }
 0xb0e   :  { %2452 = vmatmul.mubr.msk.bf16.vlgmr.msra.gmra.mxu0 %vm350_vm4, %v1079_v26 }
 0xb0f   :  { %2476 = vmatpush3.bf16.msra.mxu0 %v2910_v2  ;;  %2479 = vmatprep.mubr.msk.bf16.mxu0 %vm2826_vm0, %v2825_v1 }
 0xb10   :  { %2477 = vmatprep.subr.bf16.mxu0 %v2825_v1 }
 0xb13   :  { %2478 = vmatpush3.bf16.msra.mxu0 %v2921_v4 }
 0xb14   :  { %2483 = vmatprep.subr.bf16.mxu0 %v2825_v1 }
 0xbbe   :  { %v1045_v27 = vpop.f32.mrf.mxu0 }
 0xbbf   :  { %v1052_v61 = vrot.slane %v1045_v27, 4  ;;  %v1053_v29 = vrot.slane %v1045_v27, 5 }
 0xbc0   :  { %v2441_v58 = vpop.f32.mrf.mxu0 }
 0xbc1   :  { %v1056_v30 = vadd.f32 %v1052_v61, %v2952_v19  ;;  %v1057_v31 = vadd.f32 %v1053_v29, %v2949_v13 }
 0xbc2   :  { %v1048_v32 = vpop.f32.mrf.mxu0 }
 0xbc3   :  { %2650 = vtanh.f32 %v1056_v30  ;;  %v2268_v39 = vmul.f32 -1.442695, %v1056_v30  ;;  %v2269_v40 = vmul.f32 -1.442695, %v1057_v31 }
 0xbc4   :  { %2652 = vtanh.f32 %v1057_v31  ;;  %v2442_v2 = vpop.f32.mrf.mxu0 }
 0xbce   :  { %v1117_v33 = vpop.f32.mrf.mxu0 }
 0xbcf   :  { %v1118_v34 = vadd.f32 %v3022_v18, %v1117_v33 }
 0xbd0   :  { %v2651_v3 = vpop.eup %2650  ;;  %v2453_v35 = vpop.f32.mrf.mxu0 }
 0xbd1   :  { %v2653_v4 = vpop.eup %2652  ;;  %2654 = vtanh.f32 %v1118_v34  ;;  %1147 = vrot.lane.b32.xlu1 %v2651_v3, %s2828_s16  ;;  %v2270_v43 = vmul.f32 -1.442695, %v1118_v34 }
 0xbd2   :  { %1149 = vrot.lane.b32.xlu0 %v2653_v4, %s2828_s16  ;;  %v1120_v36 = vpop.f32.mrf.mxu0  ;;  %2656 = vpow2.f32 %v2268_v39 }
 0xbd3   :  { %2658 = vpow2.f32 %v2269_v40 }
 0xbd4   :  { %v2454_v37 = vpop.f32.mrf.mxu0  ;;  %2660 = vpow2.f32 %v2270_v43 }
 0xbde   :  { %v2655_v38 = vpop.eup %2654 }
 0xbdf   :  { %1186 = vrot.lane.b32.xlu1 %v2655_v38, %s2828_s16  ;;  %v2657_v51 = vpop.eup %2656 }
 0xbe0   :  { %v2659_v52 = vpop.eup %2658  ;;  %v1129_v23 = vadd.f32 1.0, %v2657_v51 }
 0xbe1   :  { %v1130_v54 = vadd.f32 1.0, %v2659_v52  ;;  %v2661_v25 = vpop.eup %2660 }
 0xbe2   :  { %2662 = vrcp.f32 %v1129_v23  ;;  %v1180_v55 = vadd.f32 1.0, %v2661_v25 }
 0xbe3   :  { %2664 = vrcp.f32 %v1130_v54 }
 0xbe4   :  { %2666 = vrcp.f32 %v1180_v55 }
 0xbef   :  { %v2663_v56 = vpop.eup %2662 }
 0xbf0   :  { %v2665_v59 = vpop.eup %2664  ;;  %v1143_v6 = vmul.f32 %v2663_v56, %v1139_v44 }
 0xbf1   :  { %v2667_v63 = vpop.eup %2666  ;;  %v1144_v8 = vmul.f32 %v2665_v59, %v1140_v5 }
 0xbf2   :  { %v1184_v14 = vmul.f32 %v2667_v63, %v3143_v53 }
 0xc43   :  { %v1148_v57 = vpop.permute.xlu1 %1147 }
 0xc44   :  { %v1150_v60 = vpop.permute.xlu0 %1149  ;;  %v1153_v28 = vmul.f32 %v2663_v56, %v1148_v57 }
 0xc45   :  { %v1154_v62 = vmul.f32 %v2665_v59, %v1150_v60 }
 0xc46   :  { %1157 = vrot.lane.b32.xlu0 %v1153_v28, %s2827_s0 }
 0xc47   :  { %1159 = vrot.lane.b32.xlu1 %v1154_v62, %s2827_s0 }
 0xc51   :  { %v1187_v0 = vpop.permute.xlu1 %1186 }
 0xc52   :  { %v1189_v41 = vmul.f32 %v2667_v63, %v1187_v0 }
 0xc54   :  { %1191 = vrot.lane.b32.xlu0 %v1189_v41, %s2827_s0 }
 0xcb8   :  { %v1158_v7 = vpop.permute.xlu0 %1157 }
 0xcb9   :  { %v3186_v10 = vadd.f32 %v1158_v7, %v1143_v6  ;;  %v1160_v11 = vpop.permute.xlu1 %1159 }
 0xcba   :  { %v3188_v12 = vadd.f32 %v1160_v11, %v1144_v8 }
 0xcbb   :  { %2668 = vtanh.f32 %v3186_v10 }
 0xcbc   :  { %2670 = vtanh.f32 %v3188_v12 }
 0xcc6   :  { %v1192_v15 = vpop.permute.xlu0 %1191 }
 0xcc7   :  { %v3193_v16 = vadd.f32 %v1192_v15, %v1184_v14 }
 0xcc8   :  { %v2669_v42 = vpop.eup %2668 }
 0xcc9   :  { %v2671_v17 = vpop.eup %2670  ;;  %2672 = vtanh.f32 %v3193_v16  ;;  %1169 = vrot.lane.b32.xlu1 %v2669_v42, %s2828_s16 }
 0xcca   :  { %1171 = vrot.lane.b32.xlu0 %v2671_v17, %s2828_s16 }
 0xcd6   :  { %v2673_v45 = vpop.eup %2672 }
 0xcd7   :  { %1197 = vrot.lane.b32.xlu1 %v2673_v45, %s2828_s16 }
 0xd3b   :  { %v1170_v20 = vpop.permute.xlu1 %1169 }
 0xd3c   :  { %v1175_v21 = vmul.f32 %v2663_v56, %v1170_v20  ;;  %v1172_v24 = vpop.permute.xlu0 %1171 }
 0xd3d   :  { %v1176_v26 = vmul.f32 %v2665_v59, %v1172_v24 }
 0xd3e   :  { %v1240_v27 = vpack.c.bf16 %v1175_v21, %v1175_v21 }
 0xd3f   :  { %v1241_v53 = vpack.c.bf16 %v1176_v26, %v1176_v26  ;;  %v1304_v61 = vrot.slane %v1176_v26, 7 }
 0xd40   :  { %v1244_v29 = vunpack.c.l.b16 %v1240_v27  ;;  %v1377_v27 = vrot.slane %v3186_v10, 7 }
 0xd41   :  { %v1245_v58 = vunpack.c.l.b16 %v1241_v53  ;;  %v1306_v30 = vsel %vm1305_vm8, %v1304_v61, %v1175_v21  ;;  %v1378_v53 = vrot.slane %v3188_v12, 7 }
 0xd42   :  { %v1246_v31 = vrot.slane %v1244_v29, 4  ;;  %1307 = vrot.lane.b32.xlu1 %v1306_v30, %s2827_s0 }
 0xd43   :  { %v1247_v32 = vrot.slane %v1245_v58, 3 }
 0xd45   :  { %v1248_v2 = vsel %vm253_vm3, %v1247_v32, %v1246_v31 }
 0xd46   :  { %v1249_v33 = vpack.c.b16 %v1248_v2, %v1248_v2 }
 0xd48   :  { %1250 = vrot.lane.b32.xlu0 %v1249_v33, %s2827_s0 }
 0xd49   :  { %v1198_v34 = vpop.permute.xlu1 %1197 }
 0xd4a   :  { %v3202_v3 = vmul.f32 %v2667_v63, %v1198_v34 }
 0xd4c   :  { %v1310_v35 = vrot.slane %v3202_v3, 4 }
 0xd4e   :  { %1311 = vrot.lane.b32.xlu0 %v1310_v35, %s2828_s16 }
 0xdb4   :  { %v1308_v37 = vpop.permute.xlu1 %1307 }
 0xdba   :  { %v1251_v4 = vpop.permute.xlu0 %1250 }
 0xdbb   :  { %2460 = vmatmul.mubr.msk.bf16.vlgmr.msra.gmra.mxu1 %vm140_vm2, %v1251_v4 }
 0xdbc   :  { %2464 = vmatpush3.bf16.msra.mxu1 %v2969_v46  ;;  %2471 = vmatprep.mubr.msk.bf16.mxu1 %vm2826_vm0, %v2825_v1 }
 0xdbd   :  { %2465 = vmatprep.subr.bf16.mxu1 %v2825_v1 }
 0xdc0   :  { %2466 = vmatpush3.bf16.msra.mxu1 %v2975_v47  ;;  %v1312_v36 = vpop.permute.xlu0 %1311  ;;  %v2754_v47 = vld [vmem:[%s3516_s2 + $0x8] sm:$0xff]  }
 0xdc1   :  { %2467 = vmatprep.subr.bf16.mxu1 %v2825_v1  ;;  %v1314_v38 = vsel %vm140_vm2, %v1308_v37, %v1312_v36 }
 0xdc2   :  { %v1315_v39 = vpack.c.bf16 %v1314_v38, %v1314_v38 }
 0xdc4   :  { %2468 = vmatpush3.bf16.msra.mxu1 %v2983_v49  ;;  %v1317_v46 = vrot.slane %v1315_v39, 2  ;;  %v2755_v49 = vld [vmem:[%s3516_s2] sm:$0xff]  }
 0xdc5   :  { %2469 = vmatprep.subr.bf16.mxu1 %v2825_v1 }
 0xdc8   :  { %2470 = vmatpush3.bf16.msra.mxu1 %v2991_v50 }
 0xdc9   :  { %2495 = vmatprep.subr.bf16.mxu1 %v2825_v1 }
 0xdcb   :  { %2472 = vmatmul.mubr.msk.bf16.vlgmr.msra.gmra.mxu1 %vm350_vm4, %v1317_v46 }
 0xdcc   :  { %2496 = vmatpush3.bf16.msra.mxu1 %v2754_v47  ;;  %2499 = vmatprep.mubr.msk.bf16.mxu1 %vm2826_vm0, %v2825_v1 }
 0xdcd   :  { %2497 = vmatprep.subr.bf16.mxu1 %v2825_v1 }
 0xdd0   :  { %2498 = vmatpush3.bf16.msra.mxu1 %v2755_v49 }
 0xdd1   :  { %2503 = vmatprep.subr.bf16.mxu1 %v2825_v1 }
 0xe7b   :  { %v1289_v50 = vpop.f32.mrf.mxu1 }
 0xe7c   :  { %v1296_v40 = vrot.slane %v1289_v50, 3  ;;  %v1297_v43 = vrot.slane %v1289_v50, 4 }
 0xe7d   :  { %v2461_v51 = vpop.f32.mrf.mxu1 }
 0xe7e   :  { %v1300_v52 = vadd.f32 %v1296_v40, %v2952_v19  ;;  %v1301_v23 = vadd.f32 %v1297_v43, %v2949_v13 }
 0xe7f   :  { %v1292_v54 = vpop.f32.mrf.mxu1 }
 0xe80   :  { %2674 = vtanh.f32 %v1300_v52  ;;  %v2273_v0 = vmul.f32 -1.442695, %v1300_v52  ;;  %v2274_v41 = vmul.f32 -1.442695, %v1301_v23 }
 0xe81   :  { %2676 = vtanh.f32 %v1301_v23  ;;  %v2462_v25 = vpop.f32.mrf.mxu1 }
 0xe8b   :  { %v1355_v55 = vpop.f32.mrf.mxu1 }
 0xe8c   :  { %v1356_v56 = vadd.f32 %v3022_v18, %v1355_v55 }
 0xe8d   :  { %v2675_v57 = vpop.eup %2674  ;;  %v2473_v59 = vpop.f32.mrf.mxu1 }
 0xe8e   :  { %v2677_v60 = vpop.eup %2676  ;;  %2678 = vtanh.f32 %v1356_v56  ;;  %1385 = vrot.lane.b32.xlu1 %v2675_v57, %s2828_s16  ;;  %v2275_v44 = vmul.f32 -1.442695, %v1356_v56  ;;  %v3264_v56 = vld [vmem:[%s3518_s4 + $0x18] sm:$0xff]   ;;  %v3273_v59 = vld [vmem:[%s3518_s4 + $0x10] sm:$0xff]  }
 0xe8f   :  { %1387 = vrot.lane.b32.xlu0 %v2677_v60, %s2828_s16  ;;  %v1358_v28 = vpop.f32.mrf.mxu1  ;;  %2680 = vpow2.f32 %v2273_v0 }
 0xe90   :  { %2682 = vpow2.f32 %v2274_v41  ;;  %v3281_v41 = vld [vmem:[%s3518_s4 + $0x8] sm:$0xff]  }
 0xe91   :  { %v2474_v62 = vpop.f32.mrf.mxu1  ;;  %2684 = vpow2.f32 %v2275_v44 }
 0xe9b   :  { %v2679_v63 = vpop.eup %2678 }
 0xe9c   :  { %1424 = vrot.lane.b32.xlu1 %v2679_v63, %s2828_s16  ;;  %v2681_v5 = vpop.eup %2680 }
 0xe9d   :  { %v2683_v18 = vpop.eup %2682  ;;  %v1367_v6 = vadd.f32 1.0, %v2681_v5 }
 0xe9e   :  { %v1368_v7 = vadd.f32 1.0, %v2683_v18  ;;  %v2685_v8 = vpop.eup %2684 }
 0xe9f   :  { %2686 = vrcp.f32 %v1367_v6  ;;  %v1418_v11 = vadd.f32 1.0, %v2685_v8  ;;  %v3288_v6 = vld [vmem:[%s3518_s4] sm:$0xff]  }
 0xea0   :  { %2688 = vrcp.f32 %v1368_v7 }
 0xea1   :  { %2690 = vrcp.f32 %v1418_v11 }
 0xeac   :  { %v2687_v14 = vpop.eup %2686 }
 0xead   :  { %v2689_v42 = vpop.eup %2688  ;;  %v1381_v61 = vmul.f32 %v2687_v14, %v1377_v27 }
 0xeae   :  { %v2691_v21 = vpop.eup %2690  ;;  %v1382_v58 = vmul.f32 %v2689_v42, %v1378_v53 }
 0xeaf   :  { %v1422_v2 = vmul.f32 %v2691_v21, %v3193_v16 }
 0xf00   :  { %v1386_v15 = vpop.permute.xlu1 %1385 }
 0xf01   :  { %v1388_v17 = vpop.permute.xlu0 %1387  ;;  %v1391_v45 = vmul.f32 %v2687_v14, %v1386_v15 }
 0xf02   :  { %v1392_v20 = vmul.f32 %v2689_v42, %v1388_v17 }
 0xf03   :  { %1395 = vrot.lane.b32.xlu0 %v1391_v45, %s2827_s0 }
 0xf04   :  { %1397 = vrot.lane.b32.xlu1 %v1392_v20, %s2827_s0 }
 0xf0e   :  { %v1425_v24 = vpop.permute.xlu1 %1424 }
 0xf0f   :  { %v1427_v26 = vmul.f32 %v2691_v21, %v1425_v24 }
 0xf11   :  { %1429 = vrot.lane.b32.xlu0 %v1427_v26, %s2827_s0 }
 0xf75   :  { %v1396_v29 = vpop.permute.xlu0 %1395 }
 0xf76   :  { %v3240_v30 = vadd.f32 %v1396_v29, %v1381_v61  ;;  %v1398_v31 = vpop.permute.xlu1 %1397 }
 0xf77   :  { %v3242_v32 = vadd.f32 %v1398_v31, %v1382_v58 }
 0xf78   :  { %2692 = vtanh.f32 %v3240_v30 }
 0xf79   :  { %2694 = vtanh.f32 %v3242_v32 }
 0xf83   :  { %v1430_v33 = vpop.permute.xlu0 %1429 }
 0xf84   :  { %v3247_v34 = vadd.f32 %v1430_v33, %v1422_v2 }
 0xf85   :  { %v2693_v10 = vpop.eup %2692 }
 0xf86   :  { %v2695_v35 = vpop.eup %2694  ;;  %2696 = vtanh.f32 %v3247_v34  ;;  %1407 = vrot.lane.b32.xlu1 %v2693_v10, %s2828_s16 }
 0xf87   :  { %1409 = vrot.lane.b32.xlu0 %v2695_v35, %s2828_s16 }
 0xf93   :  { %v2697_v12 = vpop.eup %2696 }
 0xf94   :  { %1435 = vrot.lane.b32.xlu1 %v2697_v12, %s2828_s16 }
 0xff8   :  { %v1408_v4 = vpop.permute.xlu1 %1407 }
 0xff9   :  { %v1410_v36 = vpop.permute.xlu0 %1409  ;;  %v1413_v37 = vmul.f32 %v2687_v14, %v1408_v4 }
 0xffa   :  { %v1414_v38 = vmul.f32 %v2689_v42, %v1410_v36 }
 0xffb   :  { %v1478_v39 = vpack.c.bf16 %v1413_v37, %v1413_v37 }
 0xffc   :  { %v1479_v16 = vpack.c.bf16 %v1414_v38, %v1414_v38  ;;  %v1542_v46 = vrot.slane %v1414_v38, 7 }
 0xffd   :  { %v1482_v47 = vunpack.c.l.b16 %v1478_v39 }
 0xffe   :  { %v1483_v49 = vunpack.c.l.b16 %v1479_v16  ;;  %v1544_v50 = vsel %vm1543_vm9, %v1542_v46, %v1413_v37 }
 0xfff   :  { %v1484_v40 = vrot.slane %v1482_v47, 5  ;;  %1545 = vrot.lane.b32.xlu1 %v1544_v50, %s2827_s0 }
0x1000   :  { %v1485_v43 = vrot.slane %v1483_v49, 4 }
0x1002   :  { %v1486_v51 = vsel %vm253_vm3, %v1485_v43, %v1484_v40 }
0x1003   :  { %v1487_v52 = vpack.c.b16 %v1486_v51, %v1486_v51  ;;  %v1621_v51 = vrot.slane %v3240_v30, 7 }
0x1005   :  { %1488 = vrot.lane.b32.xlu0 %v1487_v52, %s2827_s0  ;;  %v1622_v52 = vrot.slane %v3242_v32, 7 }
0x1006   :  { %v1436_v23 = vpop.permute.xlu1 %1435 }
0x1007   :  { %v3256_v54 = vmul.f32 %v2691_v21, %v1436_v23  ;;  %v3307_v21 = vld [vmem:[%s3519_s5] ss:$0 sm:$0xff] }
0x1009   :  { %v1548_v25 = vrot.slane %v3256_v54, 3 }
0x100b   :  { %1549 = vrot.lane.b32.xlu0 %v1548_v25, %s2828_s16 }
0x1071   :  { %v1546_v57 = vpop.permute.xlu1 %1545 }
0x1077   :  { %v1489_v55 = vpop.permute.xlu0 %1488 }
0x1078   :  { %2480 = vmatmul.mubr.msk.bf16.vlgmr.msra.gmra.mxu0 %vm140_vm2, %v1489_v55 }
0x1079   :  { %2484 = vmatpush3.bf16.msra.mxu0 %v3264_v56  ;;  %2491 = vmatprep.mubr.msk.bf16.mxu0 %vm2826_vm0, %v2825_v1 }
0x107a   :  { %2485 = vmatprep.subr.bf16.mxu0 %v2825_v1 }
0x107d   :  { %2486 = vmatpush3.bf16.msra.mxu0 %v3273_v59  ;;  %v1550_v60 = vpop.permute.xlu0 %1549 }
0x107e   :  { %v1552_v28 = vsel %vm140_vm2, %v1546_v57, %v1550_v60  ;;  %2487 = vmatprep.subr.bf16.mxu0 %v2825_v1 }
0x107f   :  { %v1553_v62 = vpack.c.bf16 %v1552_v28, %v1552_v28 }
0x1081   :  { %v1555_v63 = vshrl.u32 %v1553_v62, 16  ;;  %v1558_v0 = vshll.u32 %v1553_v62, 16  ;;  %2488 = vmatpush3.bf16.msra.mxu0 %v3281_v41 }
0x1082   :  { %2489 = vmatprep.subr.bf16.mxu0 %v2825_v1 }
0x1083   :  { %v1557_v44 = vrot.slane %v1555_v63, 2  ;;  %v1560_v5 = vrot.slane %v1558_v0, 3 }
0x1085   :  { %v1561_v18 = vor.u32 %v1560_v5, %v1557_v44  ;;  %2490 = vmatpush3.bf16.msra.mxu0 %v3288_v6 }
0x1086   :  { %2515 = vmatprep.subr.bf16.mxu0 %v2825_v1 }
0x1088   :  { %2492 = vmatmul.mubr.msk.bf16.vlgmr.msra.gmra.mxu0 %vm350_vm4, %v1561_v18 }
0x1089   :  { %2516 = vmatpush3.bf16.msra.mxu0 %v3264_v56  ;;  %2523 = vmatprep.mubr.msk.bf16.mxu0 %vm2826_vm0, %v2825_v1 }
0x108a   :  { %2517 = vmatprep.subr.bf16.mxu0 %v2825_v1 }
0x108d   :  { %2518 = vmatpush3.bf16.msra.mxu0 %v3273_v59 }
0x108e   :  { %2519 = vmatprep.subr.bf16.mxu0 %v2825_v1 }
0x1091   :  { %2520 = vmatpush3.bf16.msra.mxu0 %v3281_v41 }
0x1092   :  { %2521 = vmatprep.subr.bf16.mxu0 %v2825_v1 }
0x1095   :  { %2522 = vmatpush3.bf16.msra.mxu0 %v3288_v6 }
0x1138   :  { %v1527_v7 = vpop.f32.mrf.mxu0 }
0x1139   :  { %v1534_v8 = vrot.slane %v1527_v7, 2  ;;  %v1535_v11 = vrot.slane %v1527_v7, 3 }
0x113a   :  { %v2481_v14 = vpop.f32.mrf.mxu0 }
0x113b   :  { %v1538_v15 = vadd.f32 %v1534_v8, %v2952_v19  ;;  %v1539_v42 = vadd.f32 %v1535_v11, %v2949_v13 }
0x113c   :  { %v1530_v17 = vpop.f32.mrf.mxu0 }
0x113d   :  { %2698 = vtanh.f32 %v1538_v15  ;;  %v2278_v31 = vmul.f32 -1.442695, %v1538_v15  ;;  %v2279_v2 = vmul.f32 -1.442695, %v1539_v42 }
0x113e   :  { %2700 = vtanh.f32 %v1539_v42  ;;  %v2482_v45 = vpop.f32.mrf.mxu0 }
0x1148   :  { %v1599_v20 = vpop.f32.mrf.mxu0 }
0x1149   :  { %v1600_v24 = vadd.f32 %v3307_v21, %v1599_v20 }
0x114a   :  { %v2699_v26 = vpop.eup %2698  ;;  %v2493_v27 = vpop.f32.mrf.mxu0 }
0x114b   :  { %v2701_v53 = vpop.eup %2700  ;;  %2702 = vtanh.f32 %v1600_v24  ;;  %1629 = vrot.lane.b32.xlu1 %v2699_v26, %s2828_s16  ;;  %v2280_v33 = vmul.f32 -1.442695, %v1600_v24 }
0x114c   :  { %1631 = vrot.lane.b32.xlu0 %v2701_v53, %s2828_s16  ;;  %v1602_v61 = vpop.f32.mrf.mxu0  ;;  %2704 = vpow2.f32 %v2278_v31 }
0x114d   :  { %2706 = vpow2.f32 %v2279_v2 }
0x114e   :  { %v2494_v29 = vpop.f32.mrf.mxu0  ;;  %2708 = vpow2.f32 %v2280_v33 }
0x1158   :  { %v2703_v58 = vpop.eup %2702 }
0x1159   :  { %1668 = vrot.lane.b32.xlu1 %v2703_v58, %s2828_s16  ;;  %v2705_v10 = vpop.eup %2704 }
0x115a   :  { %v2707_v35 = vpop.eup %2706  ;;  %v1611_v12 = vadd.f32 1.0, %v2705_v10 }
0x115b   :  { %v1612_v4 = vadd.f32 1.0, %v2707_v35  ;;  %v2709_v36 = vpop.eup %2708 }
0x115c   :  { %2710 = vrcp.f32 %v1611_v12  ;;  %v1662_v37 = vadd.f32 1.0, %v2709_v36 }
0x115d   :  { %2712 = vrcp.f32 %v1612_v4 }
0x115e   :  { %2714 = vrcp.f32 %v1662_v37 }
0x1169   :  { %v2711_v38 = vpop.eup %2710 }
0x116a   :  { %v2713_v16 = vpop.eup %2712  ;;  %v1625_v23 = vmul.f32 %v2711_v38, %v1621_v51 }
0x116b   :  { %v2715_v50 = vpop.eup %2714  ;;  %v1626_v55 = vmul.f32 %v2713_v16, %v1622_v52 }
0x116c   :  { %v1666_v62 = vmul.f32 %v2715_v50, %v3247_v34 }
0x11bd   :  { %v1630_v39 = vpop.permute.xlu1 %1629 }
0x11be   :  { %v1632_v46 = vpop.permute.xlu0 %1631  ;;  %v1635_v47 = vmul.f32 %v2711_v38, %v1630_v39 }
0x11bf   :  { %v1636_v49 = vmul.f32 %v2713_v16, %v1632_v46 }
0x11c0   :  { %1639 = vrot.lane.b32.xlu0 %v1635_v47, %s2827_s0 }
0x11c1   :  { %1641 = vrot.lane.b32.xlu1 %v1636_v49, %s2827_s0 }
0x11cb   :  { %v1669_v40 = vpop.permute.xlu1 %1668 }
0x11cc   :  { %v1671_v43 = vmul.f32 %v2715_v50, %v1669_v40 }
0x11ce   :  { %1673 = vrot.lane.b32.xlu0 %v1671_v43, %s2827_s0 }
0x1232   :  { %v1640_v25 = vpop.permute.xlu0 %1639 }
0x1233   :  { %v3318_v57 = vadd.f32 %v1640_v25, %v1625_v23  ;;  %v1642_v60 = vpop.permute.xlu1 %1641 }
0x1234   :  { %v3320_v28 = vadd.f32 %v1642_v60, %v1626_v55 }
0x1235   :  { %2716 = vtanh.f32 %v3318_v57 }
0x1236   :  { %2718 = vtanh.f32 %v3320_v28 }
0x1240   :  { %v1674_v63 = vpop.permute.xlu0 %1673 }
0x1241   :  { %v3325_v0 = vadd.f32 %v1674_v63, %v1666_v62 }
0x1242   :  { %v2717_v30 = vpop.eup %2716 }
0x1243   :  { %v2719_v44 = vpop.eup %2718  ;;  %2720 = vtanh.f32 %v3325_v0  ;;  %1651 = vrot.lane.b32.xlu1 %v2717_v30, %s2828_s16 }
0x1244   :  { %1653 = vrot.lane.b32.xlu0 %v2719_v44, %s2828_s16 }
0x1250   :  { %v2721_v32 = vpop.eup %2720 }
0x1251   :  { %1679 = vrot.lane.b32.xlu1 %v2721_v32, %s2828_s16 }
0x12b5   :  { %v1652_v5 = vpop.permute.xlu1 %1651 }
0x12b6   :  { %v1657_v18 = vmul.f32 %v2711_v38, %v1652_v5  ;;  %v1654_v7 = vpop.permute.xlu0 %1653 }
0x12b7   :  { %v1658_v8 = vmul.f32 %v2713_v16, %v1654_v7 }
0x12b8   :  { %v1722_v11 = vpack.c.bf16 %v1657_v18, %v1657_v18 }
0x12b9   :  { %v1723_v34 = vpack.c.bf16 %v1658_v8, %v1658_v8  ;;  %v1786_v14 = vrot.slane %v1658_v8, 7  ;;  %v1860_v8 = vrot.slane %v3320_v28, 7 }
0x12ba   :  { %v1726_v15 = vunpack.c.l.b16 %v1722_v11 }
0x12bb   :  { %v1727_v42 = vunpack.c.l.b16 %v1723_v34  ;;  %v1788_v17 = vsel %vm1787_vm10, %v1786_v14, %v1657_v18  ;;  %v1859_v14 = vrot.slane %v3318_v57, 7 }
0x12bc   :  { %v1728_v45 = vrot.slane %v1726_v15, 6  ;;  %1789 = vrot.lane.b32.xlu1 %v1788_v17, %s2827_s0 }
0x12bd   :  { %v1729_v20 = vrot.slane %v1727_v42, 5 }
0x12bf   :  { %v1730_v24 = vsel %vm253_vm3, %v1729_v20, %v1728_v45 }
0x12c0   :  { %v1731_v26 = vpack.c.b16 %v1730_v24, %v1730_v24 }
0x12c2   :  { %1732 = vrot.lane.b32.xlu0 %v1731_v26, %s2827_s0 }
0x12c3   :  { %v1680_v27 = vpop.permute.xlu1 %1679 }
0x12c4   :  { %v3334_v53 = vmul.f32 %v2715_v50, %v1680_v27 }
0x12c6   :  { %v1792_v61 = vrot.slane %v3334_v53, 2 }
0x12c8   :  { %1793 = vrot.lane.b32.xlu0 %v1792_v61, %s2828_s16 }
0x132e   :  { %v1790_v31 = vpop.permute.xlu1 %1789 }
0x1334   :  { %v1733_v29 = vpop.permute.xlu0 %1732 }
0x1335   :  { %2500 = vmatmul.mubr.msk.bf16.vlgmr.msra.gmra.mxu1 %vm140_vm2, %v1733_v29 }
0x1336   :  { %2504 = vmatpush3.bf16.msra.mxu1 %v3264_v56  ;;  %2511 = vmatprep.mubr.msk.bf16.mxu1 %vm2826_vm0, %v2825_v1 }
0x1337   :  { %2505 = vmatprep.subr.bf16.mxu1 %v2825_v1 }
0x133a   :  { %2506 = vmatpush3.bf16.msra.mxu1 %v3273_v59  ;;  %v1794_v58 = vpop.permute.xlu0 %1793 }
0x133b   :  { %2507 = vmatprep.subr.bf16.mxu1 %v2825_v1  ;;  %v1796_v2 = vsel %vm140_vm2, %v1790_v31, %v1794_v58 }
0x133c   :  { %v1797_v33 = vpack.c.bf16 %v1796_v2, %v1796_v2 }
0x133e   :  { %2508 = vmatpush3.bf16.msra.mxu1 %v3281_v41  ;;  %v1799_v56 = vrot.slane %v1797_v33, 3 }
0x133f   :  { %2509 = vmatprep.subr.bf16.mxu1 %v2825_v1 }
0x1342   :  { %2510 = vmatpush3.bf16.msra.mxu1 %v3288_v6 }
0x1343   :  { %2527 = vmatprep.subr.bf16.mxu1 %v2825_v1 }
0x1345   :  { %2512 = vmatmul.mubr.msk.bf16.vlgmr.msra.gmra.mxu1 %vm350_vm4, %v1799_v56 }
0x1346   :  { %2531 = vmatprep.mubr.msk.bf16.mxu1 %vm2826_vm0, %v2825_v1 }
0x13f5   :  { %v1771_v59 = vpop.f32.mrf.mxu1 }
0x13f6   :  { %v1779_v10 = vrot.slane %v1771_v59, 2  ;;  %v1778_v35 = vrot.slane %v1771_v59, 1 }
0x13f7   :  { %v2501_v12 = vpop.f32.mrf.mxu1 }
0x13f8   :  { %v1783_v4 = vadd.f32 %v1779_v10, %v2949_v13  ;;  %v1782_v36 = vadd.f32 %v1778_v35, %v2952_v19 }
0x13f9   :  { %v1774_v41 = vpop.f32.mrf.mxu1 }
0x13fa   :  { %2722 = vtanh.f32 %v1783_v4  ;;  %v2284_v19 = vmul.f32 -1.442695, %v1783_v4  ;;  %v2283_v50 = vmul.f32 -1.442695, %v1782_v36 }
0x13fb   :  { %v2502_v37 = vpop.f32.mrf.mxu1  ;;  %2724 = vtanh.f32 %v1782_v36 }
0x1405   :  { %v1837_v6 = vpop.f32.mrf.mxu1 }
0x1406   :  { %v1838_v38 = vadd.f32 %v3307_v21, %v1837_v6 }
0x1407   :  { %v2513_v39 = vpop.f32.mrf.mxu1  ;;  %v2723_v16 = vpop.eup %2722 }
0x1408   :  { %2726 = vtanh.f32 %v1838_v38  ;;  %1869 = vrot.lane.b32.xlu1 %v2723_v16, %s2828_s16  ;;  %v2725_v49 = vpop.eup %2724  ;;  %v2285_v40 = vmul.f32 -1.442695, %v1838_v38 }
0x1409   :  { %v1840_v46 = vpop.f32.mrf.mxu1  ;;  %2728 = vpow2.f32 %v2284_v19 }
0x140a   :  { %2730 = vpow2.f32 %v2283_v50 }
0x140b   :  { %v2514_v47 = vpop.f32.mrf.mxu1  ;;  %2732 = vpow2.f32 %v2285_v40 }
0x140c   :  { %1867 = vrot.lane.b32.xlu1 %v2725_v49, %s2828_s16 }
0x1415   :  { %v2727_v13 = vpop.eup %2726 }
0x1416   :  { %1906 = vrot.lane.b32.xlu0 %v2727_v13, %s2828_s16  ;;  %v2729_v43 = vpop.eup %2728 }
0x1417   :  { %v1850_v51 = vadd.f32 1.0, %v2729_v43  ;;  %v2731_v52 = vpop.eup %2730 }
0x1418   :  { %v1849_v23 = vadd.f32 1.0, %v2731_v52  ;;  %v2733_v25 = vpop.eup %2732 }
0x1419   :  { %2734 = vrcp.f32 %v1850_v51  ;;  %v1900_v55 = vadd.f32 1.0, %v2733_v25  ;;  %v2829_v51 = vmov 1966171168  }
0x141a   :  { %2736 = vrcp.f32 %v1849_v23  ;;  %v478_v52 = vunpack.c.l.s4 %v2829_v51  ;;  %v480_v23 = vlaneseq }
0x141b   :  { %2738 = vrcp.f32 %v1900_v55 }
0x141c   :  { %v479_v25 = vunpack.c.0.s8 %v478_v52  ;;  %v481_v55 = vshrl.u32 %v480_v23, 7  ;;  %v2560_v23 = vld [vmem:[%s3520_s6 + $0x8] sm:$0xff]  }
0x141d   :  { %2528 = vmatpush3.bf16.msra.mxu1 %v2560_v23 }
0x141e   :  { %2529 = vmatprep.subr.bf16.mxu1 %v2825_v1 }
0x1426   :  { %v2735_v60 = vpop.eup %2734 }
0x1427   :  { %v2737_v30 = vpop.eup %2736  ;;  %v1864_v11 = vmul.f32 %v2735_v60, %v1860_v8 }
0x1428   :  { %v2739_v5 = vpop.eup %2738  ;;  %v1863_v42 = vmul.f32 %v2737_v30, %v1859_v14 }
0x1429   :  { %v1904_v20 = vmul.f32 %v2739_v5, %v3325_v0 }
0x147a   :  { %v1870_v62 = vpop.permute.xlu1 %1869 }
0x147b   :  { %v1874_v63 = vmul.f32 %v2735_v60, %v1870_v62 }
0x147d   :  { %1879 = vrot.lane.b32.xlu0 %v1874_v63, %s2827_s0 }
0x147e   :  { %v1868_v44 = vpop.permute.xlu1 %1867 }
0x147f   :  { %v1873_v32 = vmul.f32 %v2737_v30, %v1868_v44  ;;  %v3397_v44 = vsub.s32 0, %v481_v55 }
0x1481   :  { %1877 = vrot.lane.b32.xlu0 %v1873_v32, %s2827_s0 }
0x1488   :  { %v1907_v18 = vpop.permute.xlu0 %1906 }
0x1489   :  { %v1909_v7 = vmul.f32 %v2739_v5, %v1907_v18 }
0x148b   :  { %1911 = vrot.lane.b32.xlu1 %v1909_v7, %s2827_s0 }
0x14ef   :  { %v1880_v34 = vpop.permute.xlu0 %1879 }
0x14f0   :  { %v3364_v15 = vadd.f32 %v1880_v34, %v1864_v11 }
0x14f2   :  { %2740 = vtanh.f32 %v3364_v15 }
0x14f3   :  { %v1878_v17 = vpop.permute.xlu0 %1877 }
0x14f4   :  { %v3367_v45 = vadd.f32 %v1878_v17, %v1863_v42 }
0x14f6   :  { %2742 = vtanh.f32 %v3367_v45 }
0x14fd   :  { %v1912_v24 = vpop.permute.xlu1 %1911 }
0x14fe   :  { %v3371_v26 = vadd.f32 %v1912_v24, %v1904_v20 }
0x14ff   :  { %v2741_v28 = vpop.eup %2740 }
0x1500   :  { %2744 = vtanh.f32 %v3371_v26  ;;  %1891 = vrot.lane.b32.xlu1 %v2741_v28, %s2828_s16 }
0x1503   :  { %v2743_v57 = vpop.eup %2742 }
0x1504   :  { %1889 = vrot.lane.b32.xlu1 %v2743_v57, %s2828_s16 }
0x150d   :  { %v2745_v27 = vpop.eup %2744 }
0x150e   :  { %1917 = vrot.lane.b32.xlu0 %v2745_v27, %s2828_s16 }
0x1572   :  { %v1892_v61 = vpop.permute.xlu1 %1891 }
0x1573   :  { %v1896_v29 = vmul.f32 %v2735_v60, %v1892_v61  ;;  %v3390_v60 = vsub.s32 %v479_v25, %v481_v55 }
0x1575   :  { %v1962_v58 = vrot.slane %v1896_v29, 7  ;;  %v726_v32 = vrot.slane %v3102_v48, %v3390_v60  ;;  %v964_v7 = vrot.slane %v3152_v9, %v3390_v60  ;;  %v1208_v48 = vrot.slane %v3202_v3, %v3390_v60 }
0x1576   :  { %v1890_v31 = vpop.permute.xlu1 %1889  ;;  %v1446_v9 = vrot.slane %v3256_v54, %v3390_v60  ;;  %v1690_v20 = vrot.slane %v3334_v53, %v3390_v60 }
0x1577   :  { %v1895_v2 = vmul.f32 %v2737_v30, %v1890_v31  ;;  %1965 = vrot.lane.b32.xlu1 %v1962_v58, %s2827_s0  ;;  %v734_v18 = vrot.slane %v726_v32, %v3390_v60  ;;  %v972_v11 = vrot.slane %v964_v7, %v3390_v60  ;;  %v1216_v14 = vrot.slane %v1208_v48, %v3390_v60 }
0x1578   :  { %v1454_v17 = vrot.slane %v1446_v9, %v3390_v60  ;;  %v1698_v24 = vrot.slane %v1690_v20, %v3390_v60 }
0x1579   :  { %1963 = vrot.lane.b32.xlu0 %v1895_v2, %s2827_s0  ;;  %v745_v8 = vrot.slane %v734_v18, %v3397_v44  ;;  %v983_v34 = vrot.slane %v972_v11, %v3397_v44  ;;  %v1227_v42 = vrot.slane %v1216_v14, %v3397_v44 }
0x157a   :  { %v1465_v3 = vrot.slane %v1454_v17, %v3397_v44  ;;  %v1709_v54 = vrot.slane %v1698_v24, %v3397_v44 }
0x1580   :  { %v1918_v0 = vpop.permute.xlu0 %1917 }
0x1581   :  { %v3379_v33 = vmul.f32 %v2739_v5, %v1918_v0 }
0x1583   :  { %v1969_v56 = vrot.slane %v3379_v33, 1  ;;  %v1928_v28 = vrot.slane %v3379_v33, %v3390_v60 }
0x1585   :  { %1970 = vrot.lane.b32.xlu0 %v1969_v56, %s2828_s16  ;;  %v1936_v57 = vrot.slane %v1928_v28, %v3390_v60  ;;  %v727_v56 = vcombine.high %v726_v32, %v726_v32 }
0x1587   :  { %v1947_v27 = vrot.slane %v1936_v57, %v3397_v44 }
0x15e9   :  { %v1966_v59 = vpop.permute.xlu1 %1965 }
0x15ea   :  { %2092 = vst.msk [vmem:[#allocation5 + $0x1] sm:$0x1] %vm513_vm11, %v1966_v59 }
0x15eb   :  { %v1964_v10 = vpop.permute.xlu0 %1963 }
0x15ec   :  { %2091 = vst.msk [vmem:[#allocation5 - $0x7] sm:$0x80] %vm2090_vm12, %v1964_v10 }
0x15f7   :  { %v1971_v35 = vpop.permute.xlu0 %1970 }
0x15f8   :  { %v1973_v12 = vsel %vm140_vm2, %v1964_v10, %v1971_v35  ;;  %v1974_v4 = vsel %vm140_vm2, %v1966_v59, %v1971_v35  ;;  %v741_v10 = vrot.slane %v727_v56, %v3390_v60  ;;  %v965_v35 = vcombine.high %v964_v7, %v964_v7 }
0x15f9   :  { %v1975_v41 = vpack.c.bf16 %v1974_v4, %v1973_v12 }
0x15fb   :  { %v1977_v36 = vshrl.u32 %v1975_v41, 16  ;;  %v1980_v37 = vshll.u32 %v1975_v41, 16  ;;  %v979_v41 = vrot.slane %v965_v35, %v3390_v60 }
0x15fd   :  { %v1979_v6 = vrot.slane %v1977_v36, 3  ;;  %v1982_v38 = vrot.slane %v1980_v37, 4  ;;  %v1209_v36 = vcombine.high %v1208_v48, %v1208_v48  ;;  %v749_v37 = vrot.slane %v741_v10, %v3397_v44 }
0x15ff   :  { %v1983_v39 = vor.u32 %v1982_v38, %v1979_v6  ;;  %v1223_v38 = vrot.slane %v1209_v36, %v3390_v60 }
0x1601   :  { %2524 = vmatmul.mubr.msk.bf16.vlgmr.msra.gmra.mxu0 %vm350_vm4, %v1983_v39  ;;  %v1447_v39 = vcombine.high %v1446_v9, %v1446_v9 }
0x16c1   :  { %v2021_v16 = vpop.f32.mrf.mxu0 }
0x16c2   :  { %v2022_v46 = vadd.f32 %v3307_v21, %v2021_v16  ;;  %v483_v21 = vrot.slane %v3051_v22, %v3390_v60  ;;  %v987_v16 = vrot.slane %v979_v41, %v3397_v44 }
0x16c3   :  { %v2525_v47 = vpop.f32.mrf.mxu0 }
0x16c4   :  { %2746 = vtanh.f32 %v2022_v46  ;;  %v2287_v50 = vmul.f32 -1.442695, %v2022_v46  ;;  %v491_v30 = vrot.slane %v483_v21, %v3390_v60  ;;  %v484_v2 = vcombine.high %v483_v21, %v483_v21 }
0x16c5   :  { %v2024_v49 = vpop.f32.mrf.mxu0  ;;  %v1461_v47 = vrot.slane %v1447_v39, %v3390_v60 }
0x16c6   :  { %2748 = vpow2.f32 %v2287_v50  ;;  %v502_v22 = vrot.slane %v491_v30, %v3397_v44  ;;  %v498_v33 = vrot.slane %v484_v2, %v3390_v60  ;;  %v1691_v49 = vcombine.high %v1690_v20, %v1690_v20 }
0x16c7   :  { %v2526_v13 = vpop.f32.mrf.mxu0  ;;  %v1929_v50 = vcombine.high %v1928_v28, %v1928_v28 }
0x16c8   :  { %v506_v12 = vrot.slane %v498_v33, %v3397_v44  ;;  %v1231_v13 = vrot.slane %v1223_v38, %v3397_v44 }
0x16d1   :  { %v2747_v19 = vpop.eup %2746 }
0x16d2   :  { %2036 = vrot.lane.b32.xlu1 %v2747_v19, %s2828_s16  ;;  %v1705_v19 = vrot.slane %v1691_v49, %v3390_v60 }
0x16d3   :  { %v2749_v40 = vpop.eup %2748 }
0x16d4   :  { %v2030_v43 = vadd.f32 1.0, %v2749_v40  ;;  %v1469_v40 = vrot.slane %v1461_v47, %v3397_v44  ;;  %v1713_v51 = vrot.slane %v1705_v19, %v3397_v44 }
0x16d6   :  { %2750 = vrcp.f32 %v2030_v43  ;;  %v1943_v43 = vrot.slane %v1929_v50, %v3390_v60 }
0x16d8   :  { %v1951_v52 = vrot.slane %v1943_v43, %v3397_v44 }
0x16e3   :  { %v3394_v62 = vpop.eup %2750 }
0x16e4   :  { %v2034_v53 = vmul.f32 %v3394_v62, %v3371_v26 }
0x1744   :  { %v2037_v63 = vpop.permute.xlu1 %2036 }
0x1745   :  { %v2039_v5 = vmul.f32 %v3394_v62, %v2037_v63  ;;  %v2561_v63 = vld [vmem:[%s3520_s6] sm:$0xff]   ;;  %s2830_s6 = smov 96  }
0x1746   :  { %2530 = vmatpush3.bf16.msra.mxu1 %v2561_v63 }
0x1747   :  { %2041 = vrot.lane.b32.xlu0 %v2039_v5, %s2827_s0 }
0x174b   :  { %507 = vrot.lane.b32.xlu0 %v502_v22, %s2827_s0 }
0x174f   :  { %750 = vrot.lane.b32.xlu0 %v745_v8, %s2827_s0  ;;  %v2095_v8 = vrot.slane %v3364_v15, 7 }
0x1753   :  { %988 = vrot.lane.b32.xlu0 %v983_v34, %s2827_s0 }
0x1757   :  { %1232 = vrot.lane.b32.xlu0 %v1227_v42, %s2827_s0 }
0x175b   :  { %1470 = vrot.lane.b32.xlu0 %v1465_v3, %s2827_s0 }
0x175f   :  { %1714 = vrot.lane.b32.xlu0 %v1709_v54, %s2827_s0 }
0x1763   :  { %1952 = vrot.lane.b32.xlu0 %v1947_v27, %s2827_s0 }
0x17b9   :  { %v2042_v61 = vpop.permute.xlu0 %2041 }
0x17ba   :  { %v3435_v29 = vadd.f32 %v2042_v61, %v2034_v53 }
0x17bc   :  { %2752 = vtanh.f32 %v3435_v29 }
0x17bd   :  { %v508_v58 = vpop.permute.xlu0 %507 }
0x17be   :  { %514 = vst.msk [vmem:[#allocation2] sm:$0x1] %vm513_vm11, %v508_v58 }
0x17c1   :  { %v751_v31 = vpop.permute.xlu0 %750 }
0x17c2   :  { %756 = vst.msk [vmem:[#allocation2 + $0x1] sm:$0x1] %vm513_vm11, %v751_v31 }
0x17c5   :  { %v989_v0 = vpop.permute.xlu0 %988 }
0x17c6   :  { %994 = vst.msk [vmem:[#allocation2 + $0x2] sm:$0x1] %vm513_vm11, %v989_v0 }
0x17c9   :  { %v2753_v59 = vpop.eup %2752  ;;  %v1233_v26 = vpop.permute.xlu0 %1232 }
0x17ca   :  { %1238 = vst.msk [vmem:[#allocation2 + $0x3] sm:$0x1] %vm513_vm11, %v1233_v26  ;;  %2047 = vrot.lane.b32.xlu1 %v2753_v59, %s2828_s16 }
0x17cd   :  { %v1471_v4 = vpop.permute.xlu0 %1470 }
0x17ce   :  { %1476 = vst.msk [vmem:[#allocation2 + $0x4] sm:$0x1] %vm513_vm11, %v1471_v4  ;;  %509 = vrot.lane.b32.xlu1 %v506_v12, %s2827_s0 }
0x17d1   :  { %v1715_v6 = vpop.permute.xlu0 %1714 }
0x17d2   :  { %1720 = vst.msk [vmem:[#allocation2 + $0x5] sm:$0x1] %vm513_vm11, %v1715_v6  ;;  %752 = vrot.lane.b32.xlu1 %v749_v37, %s2827_s0 }
0x17d5   :  { %v1953_v46 = vpop.permute.xlu0 %1952 }
0x17d6   :  { %1958 = vst.msk [vmem:[#allocation2 + $0x6] sm:$0x1] %vm513_vm11, %v1953_v46  ;;  %990 = vrot.lane.b32.xlu1 %v987_v16, %s2827_s0 }
0x17da   :  { %1234 = vrot.lane.b32.xlu1 %v1231_v13, %s2827_s0 }
0x17de   :  { %1472 = vrot.lane.b32.xlu1 %v1469_v40, %s2827_s0 }
0x17e2   :  { %1716 = vrot.lane.b32.xlu1 %v1713_v51, %s2827_s0 }
0x17e6   :  { %1954 = vrot.lane.b32.xlu1 %v1951_v52, %s2827_s0 }
0x183c   :  { %v2048_v25 = vpop.permute.xlu1 %2047 }
0x183d   :  { %v2050_v55 = vmul.f32 %v3394_v62, %v2048_v25 }
0x183f   :  { %v2058_v21 = vrot.slane %v2050_v55, %v3390_v60 }
0x1840   :  { %v510_v30 = vpop.permute.xlu1 %509 }
0x1841   :  { %v2059_v32 = vcombine.high %v2058_v21, %v2058_v21  ;;  %v2066_v5 = vrot.slane %v2058_v21, %v3390_v60  ;;  %515 = vst.msk [vmem:[#allocation2 + $0x8] sm:$0x1] %vm513_vm11, %v510_v30 }
0x1843   :  { %v2073_v18 = vrot.slane %v2059_v32, %v3390_v60  ;;  %v2077_v62 = vrot.slane %v2066_v5, %v3397_v44 }
0x1844   :  { %v753_v7 = vpop.permute.xlu1 %752 }
0x1845   :  { %757 = vst.msk [vmem:[#allocation2 + $0x9] sm:$0x1] %vm513_vm11, %v753_v7  ;;  %2082 = vrot.lane.b32.xlu0 %v2077_v62, %s2827_s0  ;;  %v2081_v1 = vrot.slane %v2073_v18, %v3397_v44 }
0x1847   :  { %2084 = vrot.lane.b32.xlu1 %v2081_v1, %s2827_s0 }
0x1848   :  { %v991_v22 = vpop.permute.xlu1 %990 }
0x1849   :  { %995 = vst.msk [vmem:[#allocation2 + $0xa] sm:$0x1] %vm513_vm11, %v991_v22  ;;  %2104 = vrot.lane.b32.xlu0 %v2050_v55, %s2827_s0 }
0x184b   :  { %2096 = vrot.lane.b32.xlu1 %v3367_v45, %s2830_s6 }
0x184c   :  { %v1235_v60 = vpop.permute.xlu1 %1234 }
0x184d   :  { %1239 = vst.msk [vmem:[#allocation2 + $0xb] sm:$0x1] %vm513_vm11, %v1235_v60  ;;  %2098 = vrot.lane.b32.xlu0 %v2095_v8, %s2830_s6 }
0x184f   :  { %2111 = vrot.lane.b32.xlu1 %v3435_v29, %s2830_s6 }
0x1850   :  { %v1473_v11 = vpop.permute.xlu1 %1472 }
0x1851   :  { %1477 = vst.msk [vmem:[#allocation2 + $0xc] sm:$0x1] %vm513_vm11, %v1473_v11 }
0x1854   :  { %v1717_v44 = vpop.permute.xlu1 %1716 }
0x1855   :  { %1721 = vst.msk [vmem:[#allocation2 + $0xd] sm:$0x1] %vm513_vm11, %v1717_v44 }
0x1858   :  { %v1955_v48 = vpop.permute.xlu1 %1954 }
0x1859   :  { %1959 = vst.msk [vmem:[#allocation2 + $0xe] sm:$0x1] %vm513_vm11, %v1955_v48 }
0x18b7   :  { %v2083_v34 = vpop.permute.xlu0 %2082 }
0x18b8   :  { %2088 = vst.msk [vmem:[#allocation2 + $0x7] sm:$0x1] %vm513_vm11, %v2083_v34 }
0x18b9   :  { %v2085_v15 = vpop.permute.xlu1 %2084 }
0x18ba   :  { %2089 = vst.msk [vmem:[#allocation2 + $0xf] sm:$0x1] %vm513_vm11, %v2085_v15 }
0x18bb   :  { %v2105_v45 = vpop.permute.xlu0 %2104 }
0x18bc   :  { %2109 = vst.msk [vmem:[#allocation5 + $0x2] sm:$0x3] %vm2108_vm13, %v2105_v45 }
0x18bd   :  { %v2097_v14 = vpop.permute.xlu1 %2096 }
0x18be   :  { %2102 = vst.msk [vmem:[#allocation7 - $0x7] sm:$0x80] %vm2090_vm12, %v2097_v14 }
0x18bf   :  { %v2099_v9 = vpop.permute.xlu0 %2098  ;;  %v2116_v17 = vld [vmem:[#allocation2] sm:$0xff] }
0x18c0   :  { %2103 = vst.msk [vmem:[#allocation7 + $0x1] sm:$0x1] %vm513_vm11, %v2099_v9 }
0x18c1   :  { %v2112_v42 = vpop.permute.xlu1 %2111  ;;  %v2117_v20 = vld [vmem:[#allocation2 + $0x8] sm:$0xff] }
0x18c2   :  { %2115 = vst.msk [vmem:[#allocation7 + $0x2] sm:$0x3] %vm2108_vm13, %v2112_v42  ;;  %v2118_v3 = vpack.c.bf16 %v2117_v20, %v2116_v17 }
0x18c4   :  { %2532 = vmatmul.mubr.msk.bf16.vlgmr.msra.gmra.mxu1 %vm140_vm2, %v2118_v3 }
0x18c5   :  { %2772 = shalt.err (!%p2769_p4)
}
0x18c6   :  { %s2832_s8 = smov 2   ;;  %s2833_s27 = smov [#allocation7]  }
0x18c7   :  { %2211 = dma.vmem_to_hbm [thread:$0]  %s2206_s24, 64, %s3525_s11, [#allocation6], %s2827_s0, %s2827_s0, %s2832_s8  }
0x18c8   :  { %s2217_s9 = sshll.u32 %s2833_s27, 4  ;;  %s2218_s9 = int_to_ptr.vmem [resolvable:$true] %s2217_s9 }
0x18c9   :  { %s2781_s28 = scalar_lea.vmem %s2218_s9, 64  ;;  %p2786_p6 = scmp.lt.s32.totalorder %s2218_s9, %s2218_s9 }
0x18ca   :  { %p2782_p5 = scmp.ne.s32.totalorder %s2218_s9, %s2781_s28  ;;  %p2787_p7 = scmp.lt.s32.totalorder %s2781_s28, %s2781_s28 }
0x18cc   :  { %p2788_p8 = por %p2787_p7, %p2786_p6 }
0x18ce   :  { %p2789_p9 = pnand %p2788_p8, %p2782_p5 }
0x18d0   :  { %2792 = shalt.err (!%p2789_p9)
}
0x18d1   :  { %2223 = dma.vmem_to_hbm [thread:$0]  %s2218_s9, 64, %s3526_s12, [#allocation6], %s2827_s0, %s2827_s0, %s2832_s8  }
0x18d2   :  { %v2288_v24 = vld [vmem:[%s3521_s7] ss:$0 sm:$0xff]  ;;  %s2834_s11 = smov [#allocation3]  }
0x18d3   :  { %s2193_s14 = sshll.u32 %s2834_s11, 4  ;;  %s2194_s14 = int_to_ptr.vmem [resolvable:$true] %s2193_s14 }
0x18d4   :  { %s2801_s15 = scalar_lea.vmem %s2194_s14, 256  ;;  %p2806_p11 = scmp.lt.s32.totalorder %s2194_s14, %s2194_s14 }
0x18d5   :  { %p2802_p10 = scmp.ne.s32.totalorder %s2194_s14, %s2801_s15  ;;  %p2807_p12 = scmp.lt.s32.totalorder %s2801_s15, %s2801_s15 }
0x18d7   :  { %p2808_p13 = por %p2807_p12, %p2806_p11 }
0x18d9   :  { %p2809_p0 = pnand %p2808_p13, %p2802_p10 }
0x1984   :  { %v2179_v28 = vpop.f32.mrf.mxu1 }
0x1985   :  { %v2180_v54 = vadd.f32 %v2288_v24, %v2179_v28 }
0x1986   :  { %v2533_v57 = vpop.f32.mrf.mxu1 }
0x1987   :  { %2186 = vst [vmem:[#allocation3] sm:$0xff] %v2180_v54 }
0x1988   :  { %v2182_v27 = vpop.f32.mrf.mxu1 }
0x1989   :  { %v2183_v53 = vadd.f32 %v2288_v24, %v2182_v27 }
0x198a   :  { %v2534_v61 = vpop.f32.mrf.mxu1 }
0x198b   :  { %2187 = vst [vmem:[#allocation3 + $0x8] sm:$0xff] %v2183_v53 }
0x198c   :  { %2812 = shalt.err (!%p2809_p0)
}
0x198d   :  { %s2835_s12 = smov 128   ;;  %s2836_s7 = smov 8  }
0x198e   :  { %2199 = dma.vmem_to_hbm [thread:$0]  %s2194_s14, 256, %s3524_s10, [#allocation4], %s2835_s12, %s2835_s12, %s2836_s7  }
0x198f   :  { %2821 = dma.done.wait [#allocation4], 256  }
0x1990   :  { %2822 = vsyncadd [#allocation4], 4294967040 }
0x1991   :  { %2823 = dma.done.wait [#allocation6], 128  }
0x1992   :  { %2824 = vsyncadd [#allocation6], 4294967168 }
0x1993   :  { %2233 = vsyncpa [#allocation4], 1 }
0x1994   :  { %2234 = vsyncpa [#allocation6], 1 }

</bundles_post_ra>
